<compile_context>
chip_gen: v7x
topology: tpu7x:2x2x1
jax: 0.10.0
libtpu: 0.0.40
codegen_flags: <defaults>
</compile_context>

<pallas_src>
import functools

import jax
import jax.numpy as jnp
from jax.experimental import pallas as pl
from jax.experimental.pallas import tpu as pltpu

LATENT = 8
NPAD = 128           # lane-dense output-channel slab width
NEG_SLOPE = 0.01     # nn.LeakyReLU default slope


def _round_up(x, m):
    return (x + m - 1) // m * m


def _apply_act(x, act):
    if act == "leaky_relu":
        return jnp.where(x > 0, x, NEG_SLOPE * x)
    if act == "sigmoid":
        return jax.nn.sigmoid(x)
    return x


# --------------------------------------------------------------------------
# Pallas kernels
# --------------------------------------------------------------------------
def _mm_bias_act_kernel(x_ref, w_ref, b_ref, o_ref, *, act):
    """One dense matmul (taps packed along K) + fused bias + activation."""
    acc = jnp.dot(x_ref[...], w_ref[...], preferred_element_type=jnp.float32)
    o_ref[...] = _apply_act(acc + b_ref[...], act).astype(o_ref.dtype)


def _latent_kernel(h_ref, wc_ref, bc_ref, eps_ref, wd_ref, bd_ref,
                   y_ref, d0_ref, *, latent):
    """Fused z_mean/z_log_var heads + reparameterization + decoder Linear."""
    y = jnp.dot(h_ref[...], wc_ref[...], preferred_element_type=jnp.float32)
    y = y + bc_ref[...]                  # lanes [0:L] = mean, [L:2L] = logvar
    z_mean = y[:, :latent]
    z_log_var = y[:, latent:2 * latent]
    z = z_mean + jnp.exp(0.5 * z_log_var) * eps_ref[...]
    d0 = jnp.dot(z.astype(jnp.bfloat16), wd_ref[...],
                 preferred_element_type=jnp.float32) + bd_ref[...]
    y_ref[...] = y                                        # (Bp, 128) f32
    d0_ref[...] = _apply_act(d0, "leaky_relu").astype(d0_ref.dtype)


# --------------------------------------------------------------------------
# Generic fused matmul+bias+act call (M-tiled, batch folded into M)
# --------------------------------------------------------------------------
def _fused_matmul(src, w, b, act, out_dtype=jnp.bfloat16, tm=256):
    m, k = src.shape
    n = w.shape[1]
    mp = _round_up(m, 8)
    tm = min(tm, mp)
    mp = _round_up(mp, tm)
    if mp != m:
        src = jnp.pad(src, ((0, mp - m), (0, 0)))
    out = pl.pallas_call(
        functools.partial(_mm_bias_act_kernel, act=act),
        out_shape=jax.ShapeDtypeStruct((mp, n), out_dtype),
        grid=(mp // tm,),
        in_specs=[
            pl.BlockSpec((tm, k), lambda i: (i, 0)),
            pl.BlockSpec((k, n), lambda i: (0, 0)),
            pl.BlockSpec((1, n), lambda i: (0, 0)),
        ],
        out_specs=pl.BlockSpec((tm, n), lambda i: (i, 0)),
        compiler_params=pltpu.CompilerParams(
            dimension_semantics=("parallel",)),
    )(src, w, b)
    return out[:m]


# --------------------------------------------------------------------------
# Conv2d: wrapper packs the kh*kw taps densely along K (real channels only)
# --------------------------------------------------------------------------
def conv2d_nhwc(x, w_oihw, b, stride, pad, act):
    """Conv2d on NHWC input; PyTorch weight layout (Cout, Cin, kh, kw)."""
    B, H, W, cin = x.shape
    cout, _, kh, kw = w_oihw.shape
    Ho = (H + 2 * pad - kh) // stride + 1
    Wo = (W + 2 * pad - kw) // stride + 1

    xp = jnp.pad(x, ((0, 0), (pad, pad), (pad, pad), (0, 0)))
    taps = [xp[:, i:i + stride * (Ho - 1) + 1:stride,
               j:j + stride * (Wo - 1) + 1:stride, :]
            for i in range(kh) for j in range(kw)]
    kraw = kh * kw * cin
    kdim = _round_up(kraw, 8)
    src = jnp.concatenate(taps, axis=-1).reshape(B * Ho * Wo, kraw)
    src = jnp.pad(src, ((0, 0), (0, kdim - kraw))).astype(jnp.bfloat16)

    wm = jnp.transpose(w_oihw, (2, 3, 1, 0)).reshape(kraw, cout)
    wm = jnp.pad(wm, ((0, kdim - kraw), (0, NPAD - cout))).astype(jnp.bfloat16)
    bm = jnp.pad(b, (0, NPAD - cout)).reshape(1, NPAD).astype(jnp.float32)

    out = _fused_matmul(src, wm, bm, act)            # (B*Ho*Wo, 128) bf16
    return out.reshape(B, Ho, Wo, NPAD)[..., :cout]


# --------------------------------------------------------------------------
# ConvTranspose2d(k=3, s=2, p=1, op=1): one matmul -- 4 input taps packed
# along K, 4 sub-pixel output phases packed along N.
# --------------------------------------------------------------------------
_CT_TAP_ASSIGN = (
    # (tap t = di*2+dj -> x(i+di, j+dj), phase p = pi*2+pj -> out(2i+pi,2j+pj),
    #  PyTorch weight tap (kh, kw))
    (0, 0, 1, 1),
    (0, 1, 1, 2), (1, 1, 1, 0),
    (0, 2, 2, 1), (2, 2, 0, 1),
    (0, 3, 2, 2), (1, 3, 2, 0), (2, 3, 0, 2), (3, 3, 0, 0),
)


def conv_transpose2d_nhwc(x, w_iohw, b, act):
    """ConvTranspose2d on NHWC input; PyTorch weight layout (Cin, Cout, 3, 3)."""
    B, H, W, cin = x.shape
    cout = w_iohw.shape[1]

    xp = jnp.pad(x, ((0, 0), (0, 1), (0, 1), (0, 0)))       # zero-guard i+1,j+1
    taps = [xp[:, di:di + H, dj:dj + W, :] for di in range(2) for dj in range(2)]
    src = jnp.concatenate(taps, axis=-1).reshape(B * H * W, 4 * cin)
    src = src.astype(jnp.bfloat16)

    wp = jnp.zeros((4 * cin, 4 * cout), jnp.float32)
    for t, p, ki, kj in _CT_TAP_ASSIGN:
        wp = wp.at[t * cin:(t + 1) * cin, p * cout:(p + 1) * cout].set(
            w_iohw[:, :, ki, kj])
    wp = jnp.pad(wp, ((0, 0), (0, NPAD - 4 * cout))).astype(jnp.bfloat16)
    bp = jnp.pad(jnp.tile(b, 4), (0, NPAD - 4 * cout)).reshape(1, NPAD)
    bp = bp.astype(jnp.float32)

    out = _fused_matmul(src, wp, bp, act)                    # (B*H*W, 128)
    out = out.reshape(B, H, W, NPAD)[..., :4 * cout]
    out = out.reshape(B, H, W, 2, 2, cout).transpose(0, 1, 3, 2, 4, 5)
    return out.reshape(B, 2 * H, 2 * W, cout)


# --------------------------------------------------------------------------
# Fused latent heads + sampling + decoder Linear.  The NCHW<->NHWC flatten
# permutations are applied to the weight matrices, never to activations.
# --------------------------------------------------------------------------
def latent_and_decoder_fc(h_flat, params, eps):
    B = h_flat.shape[0]
    L, C2, S2 = LATENT, 32, 16                        # enc conv2: 32 ch, 4*4

    def perm_rows(w):                                 # NCHW row -> NHWC row
        return w.reshape(C2, S2, -1).transpose(1, 0, 2).reshape(C2 * S2, -1)

    wcat = jnp.concatenate([perm_rows(params["fm_w"]),
                            perm_rows(params["fv_w"])], axis=1)      # (512,2L)
    wcat = jnp.pad(wcat, ((0, 0), (0, NPAD - 2 * L))).astype(jnp.bfloat16)
    bcat = jnp.pad(jnp.concatenate([params["fm_b"], params["fv_b"]]),
                   (0, NPAD - 2 * L)).reshape(1, NPAD).astype(jnp.float32)

    # decoder Linear: permute output columns NCHW(view) -> NHWC
    wd = params["df_w"].reshape(L, C2, S2).transpose(0, 2, 1).reshape(L, C2 * S2)
    bd = params["df_b"].reshape(C2, S2).T.reshape(C2 * S2)

    Bp = _round_up(B, 8)
    hp = jnp.pad(h_flat, ((0, Bp - B), (0, 0))).astype(jnp.bfloat16)
    ep = jnp.pad(eps, ((0, Bp - B), (0, 0))).astype(jnp.float32)

    vmem = pl.BlockSpec(memory_space=pltpu.MemorySpace.VMEM)
    y, d0 = pl.pallas_call(
        functools.partial(_latent_kernel, latent=L),
        out_shape=(jax.ShapeDtypeStruct((Bp, NPAD), jnp.float32),
                   jax.ShapeDtypeStruct((Bp, C2 * S2), jnp.bfloat16)),
        in_specs=[vmem] * 6,
        out_specs=(vmem, vmem),
    )(hp, wcat, bcat, ep, wd.astype(jnp.bfloat16),
      bd.reshape(1, -1).astype(jnp.float32))
    return y[:B, :L], y[:B, L:2 * L], d0[:B]


# --------------------------------------------------------------------------
# Parameters (deterministic synthetic init) and forward pass
# --------------------------------------------------------------------------
def init_params(key):
    def g(k, shape, scale=0.1):
        return scale * jax.random.normal(k, shape, jnp.float32)

    ks = jax.random.split(key, 16)
    return {
        # encoder
        "ec1_w": g(ks[0], (16, 3, 3, 3)),  "ec1_b": g(ks[1], (16,)),
        "ec2_w": g(ks[2], (32, 16, 3, 3)), "ec2_b": g(ks[3], (32,)),
        "fm_w": g(ks[4], (32 * 4 * 4, LATENT)), "fm_b": g(ks[5], (LATENT,)),
        "fv_w": g(ks[6], (32 * 4 * 4, LATENT)), "fv_b": g(ks[7], (LATENT,)),
        # decoder
        "df_w": g(ks[8], (LATENT, 32 * 4 * 4)), "df_b": g(ks[9], (32 * 4 * 4,)),
        "dt1_w": g(ks[10], (32, 16, 3, 3)), "dt1_b": g(ks[11], (16,)),
        "dt2_w": g(ks[12], (16, 16, 3, 3)), "dt2_b": g(ks[13], (16,)),
        "do_w": g(ks[14], (3, 16, 3, 3)),  "do_b": g(ks[15], (3,)),
    }


def vae_forward(params, x_nchw, eps, training=False):
    """Returns (z_mean, z_log_var, reconstruction) like the PyTorch VAE."""
    del training  # only gated BatchNorm/Dropout in the original; omitted here
    x = jnp.transpose(x_nchw, (0, 2, 3, 1))                        # NCHW->NHWC
    B = x.shape[0]

    # ---------------- encoder ----------------
    h = conv2d_nhwc(x, params["ec1_w"], params["ec1_b"], 2, 1, "leaky_relu")
    h = conv2d_nhwc(h, params["ec2_w"], params["ec2_b"], 2, 1, "leaky_relu")
    z_mean, z_log_var, d0 = latent_and_decoder_fc(h.reshape(B, -1), params, eps)

    # ---------------- decoder ----------------
    d = d0.reshape(B, 4, 4, 32)               # already NHWC (df_w cols permuted)
    d = conv_transpose2d_nhwc(d, params["dt1_w"], params["dt1_b"], "leaky_relu")
    d = conv_transpose2d_nhwc(d, params["dt2_w"], params["dt2_b"], "leaky_relu")
    d = conv2d_nhwc(d, params["do_w"], params["do_b"], 1, 1, "sigmoid")
    recon = jnp.transpose(d, (0, 3, 1, 2)).astype(jnp.float32)      # NCHW f32
    return z_mean, z_log_var, recon


# --------------------------------------------------------------------------
# Pure-JAX f32 reference (PyTorch semantics) for numerical validation
# --------------------------------------------------------------------------
def vae_forward_ref(params, x_nchw, eps):
    hi = jax.lax.Precision.HIGHEST
    dn = ("NCHW", "OIHW", "NCHW")

    def lrelu(v):
        return jnp.where(v > 0, v, NEG_SLOPE * v)

    def conv(v, w, b, s, p):
        y = jax.lax.conv_general_dilated(v, w, (s, s), ((p, p), (p, p)),
                                         dimension_numbers=dn, precision=hi)
        return y + b.reshape(1, -1, 1, 1)

    def convT(v, w_iohw, b):      # k=3, s=2, p=1, op=1
        w = jnp.flip(jnp.transpose(w_iohw, (1, 0, 2, 3)), axis=(2, 3))
        y = jax.lax.conv_general_dilated(v, w, (1, 1), ((1, 2), (1, 2)),
                                         lhs_dilation=(2, 2),
                                         dimension_numbers=dn, precision=hi)
        return y + b.reshape(1, -1, 1, 1)

    h = lrelu(conv(x_nchw, params["ec1_w"], params["ec1_b"], 2, 1))
    h = lrelu(conv(h, params["ec2_w"], params["ec2_b"], 2, 1))
    B = x_nchw.shape[0]
    hf = h.reshape(B, -1)
    z_mean = jnp.dot(hf, params["fm_w"], precision=hi) + params["fm_b"]
    z_log_var = jnp.dot(hf, params["fv_w"], precision=hi) + params["fv_b"]
    z = z_mean + jnp.exp(0.5 * z_log_var) * eps
    d0 = lrelu(jnp.dot(z, params["df_w"], precision=hi) + params["df_b"])
    d = d0.reshape(B, 32, 4, 4)
    d = lrelu(convT(d, params["dt1_w"], params["dt1_b"]))
    d = lrelu(convT(d, params["dt2_w"], params["dt2_b"]))
    recon = jax.nn.sigmoid(conv(d, params["do_w"], params["do_b"], 1, 1))
    return z_mean, z_log_var, recon


if __name__ == "__main__":
    key = jax.random.PRNGKey(0)
    kx, keps, kp = jax.random.split(key, 3)
    x = jax.random.normal(kx, (2, 3, 16, 16), jnp.float32)     # NCHW input
    eps = jax.random.normal(keps, (2, LATENT), jnp.float32)    # reparam noise
    params = init_params(kp)

    fwd = jax.jit(vae_forward)
    z_mean, z_log_var, recon = fwd(params, x, eps)
    jax.block_until_ready((z_mean, z_log_var, recon))

    assert z_mean.shape == (2, LATENT)
    assert z_log_var.shape == (2, LATENT)
    assert recon.shape == (2, 3, 16, 16)
    assert bool(jnp.all(jnp.isfinite(recon)))
    assert bool(jnp.all((recon >= 0.0) & (recon <= 1.0)))

    # Numerical check against the pure-JAX f32 reference (bf16-MXU tolerance).
    rm, rv, rr = vae_forward_ref(params, x, eps)
    assert float(jnp.max(jnp.abs(z_mean - rm))) < 3e-2
    assert float(jnp.max(jnp.abs(z_log_var - rv))) < 3e-2
    assert float(jnp.max(jnp.abs(recon - rr))) < 3e-2
    print("KERNEL_OK")
</pallas_src>

<mosaic_0001>
module attributes {stable_mosaic.version = 11 : i64} {
  func.func @_mm_bias_act_kernel(%arg0: i32, %arg1: memref<128x32xbf16, #tpu.memory_space<vmem>>, %arg2: memref<32x128xbf16, #tpu.memory_space<vmem>>, %arg3: memref<1x128xf32, #tpu.memory_space<vmem>>, %arg4: memref<128x128xbf16, #tpu.memory_space<vmem>>) attributes {dimension_semantics = [#tpu.dimension_semantics<parallel>], iteration_bounds = array<i64: 1>, scalar_prefetch = 0 : i64, scratch_operands = 0 : i64, tpu.core_type = #tpu.core_type<tc>, window_params = [{transform_indices = @transform_0, window_bounds = array<i64: 128, 32>}, {pipeline_mode = #tpu.pipeline_mode<synchronous>, transform_indices = @transform_1, window_bounds = array<i64: 32, 128>}, {pipeline_mode = #tpu.pipeline_mode<synchronous>, transform_indices = @transform_2, window_bounds = array<i64: 1, 128>}, {transform_indices = @transform_3, window_bounds = array<i64: 128, 128>}]} {
    %c0 = arith.constant 0 : index
    %c0_0 = arith.constant 0 : index
    %0 = vector.load %arg1[%c0, %c0_0] : memref<128x32xbf16, #tpu.memory_space<vmem>>, vector<128x32xbf16>
    %c0_1 = arith.constant 0 : index
    %c0_2 = arith.constant 0 : index
    %1 = vector.load %arg2[%c0_1, %c0_2] : memref<32x128xbf16, #tpu.memory_space<vmem>>, vector<32x128xbf16>
    %cst = arith.constant dense<0.000000e+00> : vector<128x128xf32>
    %2 = tpu.matmul %0, %1, %cst {dimension_numbers = #tpu.dot_dimension_numbers<[1], [0], [0], [1], [0, 0, 1, 1], [], []>} : vector<128x32xbf16>, vector<32x128xbf16>, vector<128x128xf32> -> vector<128x128xf32>
    %c0_3 = arith.constant 0 : index
    %c0_4 = arith.constant 0 : index
    %3 = vector.load %arg3[%c0_3, %c0_4] : memref<1x128xf32, #tpu.memory_space<vmem>>, vector<1x128xf32>
    %4 = vector.broadcast %3 : vector<1x128xf32> to vector<128x128xf32>
    %5 = arith.addf %2, %4 : vector<128x128xf32>
    %cst_5 = arith.constant 0.000000e+00 : f32
    %6 = vector.broadcast %cst_5 : f32 to vector<128x128xf32>
    %7 = arith.cmpf ogt, %5, %6 : vector<128x128xf32>
    %cst_6 = arith.constant 0.00999999977 : f32
    %8 = vector.broadcast %cst_6 : f32 to vector<128x128xf32>
    %9 = arith.mulf %8, %5 : vector<128x128xf32>
    %10 = arith.select %7, %5, %9 : vector<128x128xi1>, vector<128x128xf32>
    %11 = arith.truncf %10 : vector<128x128xf32> to vector<128x128xbf16>
    %c0_7 = arith.constant 0 : index
    %c0_8 = arith.constant 0 : index
    %12 = vector.load %arg4[%c0_7, %c0_8] : memref<128x128xbf16, #tpu.memory_space<vmem>>, vector<128x128xbf16>
    tpu.vector_store %arg4[%c0_7, %c0_8], %11 {strides = array<i32>} : memref<128x128xbf16, #tpu.memory_space<vmem>>, vector<128x128xbf16>,
    return
  }
  func.func @transform_0(%arg0: i32) -> (i32, i32) {
    %c0_i32 = arith.constant 0 : i32
    %c0_i32_0 = arith.constant 0 : i32
    return %arg0, %c0_i32 : i32, i32
  }
  func.func @transform_1(%arg0: i32) -> (i32, i32) {
    %c0_i32 = arith.constant 0 : i32
    %c0_i32_0 = arith.constant 0 : i32
    %c0_i32_1 = arith.constant 0 : i32
    return %c0_i32, %c0_i32_0 : i32, i32
  }
  func.func @transform_2(%arg0: i32) -> (i32, i32) {
    %c0_i32 = arith.constant 0 : i32
    %c0_i32_0 = arith.constant 0 : i32
    %c0_i32_1 = arith.constant 0 : i32
    return %c0_i32, %c0_i32_0 : i32, i32
  }
  func.func @transform_3(%arg0: i32) -> (i32, i32) {
    %c0_i32 = arith.constant 0 : i32
    %c0_i32_0 = arith.constant 0 : i32
    return %arg0, %c0_i32 : i32, i32
  }
}

module attributes {stable_mosaic.version = 11 : i64} {
  func.func @_mm_bias_act_kernel(%arg0: i32, %arg1: memref<32x144xbf16, #tpu.memory_space<vmem>>, %arg2: memref<144x128xbf16, #tpu.memory_space<vmem>>, %arg3: memref<1x128xf32, #tpu.memory_space<vmem>>, %arg4: memref<32x128xbf16, #tpu.memory_space<vmem>>) attributes {dimension_semantics = [#tpu.dimension_semantics<parallel>], iteration_bounds = array<i64: 1>, scalar_prefetch = 0 : i64, scratch_operands = 0 : i64, tpu.core_type = #tpu.core_type<tc>, window_params = [{transform_indices = @transform_0, window_bounds = array<i64: 32, 144>}, {pipeline_mode = #tpu.pipeline_mode<synchronous>, transform_indices = @transform_1, window_bounds = array<i64: 144, 128>}, {pipeline_mode = #tpu.pipeline_mode<synchronous>, transform_indices = @transform_2, window_bounds = array<i64: 1, 128>}, {transform_indices = @transform_3, window_bounds = array<i64: 32, 128>}]} {
    %c0 = arith.constant 0 : index
    %c0_0 = arith.constant 0 : index
    %0 = vector.load %arg1[%c0, %c0_0] : memref<32x144xbf16, #tpu.memory_space<vmem>>, vector<32x144xbf16>
    %c0_1 = arith.constant 0 : index
    %c0_2 = arith.constant 0 : index
    %1 = vector.load %arg2[%c0_1, %c0_2] : memref<144x128xbf16, #tpu.memory_space<vmem>>, vector<144x128xbf16>
    %cst = arith.constant dense<0.000000e+00> : vector<32x128xf32>
    %2 = tpu.matmul %0, %1, %cst {dimension_numbers = #tpu.dot_dimension_numbers<[1], [0], [0], [1], [0, 0, 1, 1], [], []>} : vector<32x144xbf16>, vector<144x128xbf16>, vector<32x128xf32> -> vector<32x128xf32>
    %c0_3 = arith.constant 0 : index
    %c0_4 = arith.constant 0 : index
    %3 = vector.load %arg3[%c0_3, %c0_4] : memref<1x128xf32, #tpu.memory_space<vmem>>, vector<1x128xf32>
    %4 = vector.broadcast %3 : vector<1x128xf32> to vector<32x128xf32>
    %5 = arith.addf %2, %4 : vector<32x128xf32>
    %cst_5 = arith.constant 0.000000e+00 : f32
    %6 = vector.broadcast %cst_5 : f32 to vector<32x128xf32>
    %7 = arith.cmpf ogt, %5, %6 : vector<32x128xf32>
    %cst_6 = arith.constant 0.00999999977 : f32
    %8 = vector.broadcast %cst_6 : f32 to vector<32x128xf32>
    %9 = arith.mulf %8, %5 : vector<32x128xf32>
    %10 = arith.select %7, %5, %9 : vector<32x128xi1>, vector<32x128xf32>
    %11 = arith.truncf %10 : vector<32x128xf32> to vector<32x128xbf16>
    %c0_7 = arith.constant 0 : index
    %c0_8 = arith.constant 0 : index
    %12 = vector.load %arg4[%c0_7, %c0_8] : memref<32x128xbf16, #tpu.memory_space<vmem>>, vector<32x128xbf16>
    tpu.vector_store %arg4[%c0_7, %c0_8], %11 {strides = array<i32>} : memref<32x128xbf16, #tpu.memory_space<vmem>>, vector<32x128xbf16>,
    return
  }
  func.func @transform_0(%arg0: i32) -> (i32, i32) {
    %c0_i32 = arith.constant 0 : i32
    %c0_i32_0 = arith.constant 0 : i32
    return %arg0, %c0_i32 : i32, i32
  }
  func.func @transform_1(%arg0: i32) -> (i32, i32) {
    %c0_i32 = arith.constant 0 : i32
    %c0_i32_0 = arith.constant 0 : i32
    %c0_i32_1 = arith.constant 0 : i32
    return %c0_i32, %c0_i32_0 : i32, i32
  }
  func.func @transform_2(%arg0: i32) -> (i32, i32) {
    %c0_i32 = arith.constant 0 : i32
    %c0_i32_0 = arith.constant 0 : i32
    %c0_i32_1 = arith.constant 0 : i32
    return %c0_i32, %c0_i32_0 : i32, i32
  }
  func.func @transform_3(%arg0: i32) -> (i32, i32) {
    %c0_i32 = arith.constant 0 : i32
    %c0_i32_0 = arith.constant 0 : i32
    return %arg0, %c0_i32 : i32, i32
  }
}

module attributes {stable_mosaic.version = 11 : i64} {
  func.func @_latent_kernel(%arg0: memref<8x512xbf16, #tpu.memory_space<vmem>>, %arg1: memref<512x128xbf16, #tpu.memory_space<vmem>>, %arg2: memref<1x128xf32, #tpu.memory_space<vmem>>, %arg3: memref<8x8xf32, #tpu.memory_space<vmem>>, %arg4: memref<8x512xbf16, #tpu.memory_space<vmem>>, %arg5: memref<1x512xf32, #tpu.memory_space<vmem>>, %arg6: memref<8x128xf32, #tpu.memory_space<vmem>>, %arg7: memref<8x512xbf16, #tpu.memory_space<vmem>>) attributes {dimension_semantics = [], scalar_prefetch = 0 : i64, scratch_operands = 0 : i64, tpu.core_type = #tpu.core_type<tc>} {
    %c0 = arith.constant 0 : index
    %c0_0 = arith.constant 0 : index
    %0 = vector.load %arg0[%c0, %c0_0] : memref<8x512xbf16, #tpu.memory_space<vmem>>, vector<8x512xbf16>
    %c0_1 = arith.constant 0 : index
    %c0_2 = arith.constant 0 : index
    %1 = vector.load %arg1[%c0_1, %c0_2] : memref<512x128xbf16, #tpu.memory_space<vmem>>, vector<512x128xbf16>
    %cst = arith.constant dense<0.000000e+00> : vector<8x128xf32>
    %2 = tpu.matmul %0, %1, %cst {dimension_numbers = #tpu.dot_dimension_numbers<[1], [0], [0], [1], [0, 0, 1, 1], [], []>} : vector<8x512xbf16>, vector<512x128xbf16>, vector<8x128xf32> -> vector<8x128xf32>
    %c0_3 = arith.constant 0 : index
    %c0_4 = arith.constant 0 : index
    %3 = vector.load %arg2[%c0_3, %c0_4] : memref<1x128xf32, #tpu.memory_space<vmem>>, vector<1x128xf32>
    %4 = vector.broadcast %3 : vector<1x128xf32> to vector<8x128xf32>
    %5 = arith.addf %2, %4 : vector<8x128xf32>
    %6 = vector.extract_strided_slice %5 {offsets = [0, 0], sizes = [8, 8], strides = [1, 1]} : vector<8x128xf32> to vector<8x8xf32>
    %7 = vector.extract_strided_slice %5 {offsets = [0, 8], sizes = [8, 8], strides = [1, 1]} : vector<8x128xf32> to vector<8x8xf32>
    %cst_5 = arith.constant 5.000000e-01 : f32
    %8 = vector.broadcast %cst_5 : f32 to vector<8x8xf32>
    %9 = arith.mulf %8, %7 : vector<8x8xf32>
    %10 = math.exp %9 : vector<8x8xf32>
    %c0_6 = arith.constant 0 : index
    %c0_7 = arith.constant 0 : index
    %11 = vector.load %arg3[%c0_6, %c0_7] : memref<8x8xf32, #tpu.memory_space<vmem>>, vector<8x8xf32>
    %12 = arith.mulf %10, %11 : vector<8x8xf32>
    %13 = arith.addf %6, %12 : vector<8x8xf32>
    %14 = arith.truncf %13 : vector<8x8xf32> to vector<8x8xbf16>
    %c0_8 = arith.constant 0 : index
    %c0_9 = arith.constant 0 : index
    %15 = vector.load %arg4[%c0_8, %c0_9] : memref<8x512xbf16, #tpu.memory_space<vmem>>, vector<8x512xbf16>
    %cst_10 = arith.constant dense<0.000000e+00> : vector<8x512xf32>
    %16 = tpu.matmul %14, %15, %cst_10 {dimension_numbers = #tpu.dot_dimension_numbers<[1], [0], [0], [1], [0, 0, 1, 1], [], []>} : vector<8x8xbf16>, vector<8x512xbf16>, vector<8x512xf32> -> vector<8x512xf32>
    %c0_11 = arith.constant 0 : index
    %c0_12 = arith.constant 0 : index
    %17 = vector.load %arg5[%c0_11, %c0_12] : memref<1x512xf32, #tpu.memory_space<vmem>>, vector<1x512xf32>
    %18 = vector.broadcast %17 : vector<1x512xf32> to vector<8x512xf32>
    %19 = arith.addf %16, %18 : vector<8x512xf32>
    %c0_13 = arith.constant 0 : index
    %c0_14 = arith.constant 0 : index
    %20 = vector.load %arg6[%c0_13, %c0_14] : memref<8x128xf32, #tpu.memory_space<vmem>>, vector<8x128xf32>
    tpu.vector_store %arg6[%c0_13, %c0_14], %5 {strides = array<i32>} : memref<8x128xf32, #tpu.memory_space<vmem>>, vector<8x128xf32>,
    %cst_15 = arith.constant 0.000000e+00 : f32
    %21 = vector.broadcast %cst_15 : f32 to vector<8x512xf32>
    %22 = arith.cmpf ogt, %19, %21 : vector<8x512xf32>
    %cst_16 = arith.constant 0.00999999977 : f32
    %23 = vector.broadcast %cst_16 : f32 to vector<8x512xf32>
    %24 = arith.mulf %23, %19 : vector<8x512xf32>
    %25 = arith.select %22, %19, %24 : vector<8x512xi1>, vector<8x512xf32>
    %26 = arith.truncf %25 : vector<8x512xf32> to vector<8x512xbf16>
    %c0_17 = arith.constant 0 : index
    %c0_18 = arith.constant 0 : index
    %27 = vector.load %arg7[%c0_17, %c0_18] : memref<8x512xbf16, #tpu.memory_space<vmem>>, vector<8x512xbf16>
    tpu.vector_store %arg7[%c0_17, %c0_18], %26 {strides = array<i32>} : memref<8x512xbf16, #tpu.memory_space<vmem>>, vector<8x512xbf16>,
    return
  }
}

module attributes {stable_mosaic.version = 11 : i64} {
  func.func @_mm_bias_act_kernel(%arg0: i32, %arg1: memref<32x128xbf16, #tpu.memory_space<vmem>>, %arg2: memref<128x128xbf16, #tpu.memory_space<vmem>>, %arg3: memref<1x128xf32, #tpu.memory_space<vmem>>, %arg4: memref<32x128xbf16, #tpu.memory_space<vmem>>) attributes {dimension_semantics = [#tpu.dimension_semantics<parallel>], iteration_bounds = array<i64: 1>, scalar_prefetch = 0 : i64, scratch_operands = 0 : i64, tpu.core_type = #tpu.core_type<tc>, window_params = [{transform_indices = @transform_0, window_bounds = array<i64: 32, 128>}, {pipeline_mode = #tpu.pipeline_mode<synchronous>, transform_indices = @transform_1, window_bounds = array<i64: 128, 128>}, {pipeline_mode = #tpu.pipeline_mode<synchronous>, transform_indices = @transform_2, window_bounds = array<i64: 1, 128>}, {transform_indices = @transform_3, window_bounds = array<i64: 32, 128>}]} {
    %c0 = arith.constant 0 : index
    %c0_0 = arith.constant 0 : index
    %0 = vector.load %arg1[%c0, %c0_0] : memref<32x128xbf16, #tpu.memory_space<vmem>>, vector<32x128xbf16>
    %c0_1 = arith.constant 0 : index
    %c0_2 = arith.constant 0 : index
    %1 = vector.load %arg2[%c0_1, %c0_2] : memref<128x128xbf16, #tpu.memory_space<vmem>>, vector<128x128xbf16>
    %cst = arith.constant dense<0.000000e+00> : vector<32x128xf32>
    %2 = tpu.matmul %0, %1, %cst {dimension_numbers = #tpu.dot_dimension_numbers<[1], [0], [0], [1], [0, 0, 1, 1], [], []>} : vector<32x128xbf16>, vector<128x128xbf16>, vector<32x128xf32> -> vector<32x128xf32>
    %c0_3 = arith.constant 0 : index
    %c0_4 = arith.constant 0 : index
    %3 = vector.load %arg3[%c0_3, %c0_4] : memref<1x128xf32, #tpu.memory_space<vmem>>, vector<1x128xf32>
    %4 = vector.broadcast %3 : vector<1x128xf32> to vector<32x128xf32>
    %5 = arith.addf %2, %4 : vector<32x128xf32>
    %cst_5 = arith.constant 0.000000e+00 : f32
    %6 = vector.broadcast %cst_5 : f32 to vector<32x128xf32>
    %7 = arith.cmpf ogt, %5, %6 : vector<32x128xf32>
    %cst_6 = arith.constant 0.00999999977 : f32
    %8 = vector.broadcast %cst_6 : f32 to vector<32x128xf32>
    %9 = arith.mulf %8, %5 : vector<32x128xf32>
    %10 = arith.select %7, %5, %9 : vector<32x128xi1>, vector<32x128xf32>
    %11 = arith.truncf %10 : vector<32x128xf32> to vector<32x128xbf16>
    %c0_7 = arith.constant 0 : index
    %c0_8 = arith.constant 0 : index
    %12 = vector.load %arg4[%c0_7, %c0_8] : memref<32x128xbf16, #tpu.memory_space<vmem>>, vector<32x128xbf16>
    tpu.vector_store %arg4[%c0_7, %c0_8], %11 {strides = array<i32>} : memref<32x128xbf16, #tpu.memory_space<vmem>>, vector<32x128xbf16>,
    return
  }
  func.func @transform_0(%arg0: i32) -> (i32, i32) {
    %c0_i32 = arith.constant 0 : i32
    %c0_i32_0 = arith.constant 0 : i32
    return %arg0, %c0_i32 : i32, i32
  }
  func.func @transform_1(%arg0: i32) -> (i32, i32) {
    %c0_i32 = arith.constant 0 : i32
    %c0_i32_0 = arith.constant 0 : i32
    %c0_i32_1 = arith.constant 0 : i32
    return %c0_i32, %c0_i32_0 : i32, i32
  }
  func.func @transform_2(%arg0: i32) -> (i32, i32) {
    %c0_i32 = arith.constant 0 : i32
    %c0_i32_0 = arith.constant 0 : i32
    %c0_i32_1 = arith.constant 0 : i32
    return %c0_i32, %c0_i32_0 : i32, i32
  }
  func.func @transform_3(%arg0: i32) -> (i32, i32) {
    %c0_i32 = arith.constant 0 : i32
    %c0_i32_0 = arith.constant 0 : i32
    return %arg0, %c0_i32 : i32, i32
  }
}

module attributes {stable_mosaic.version = 11 : i64} {
  func.func @_mm_bias_act_kernel(%arg0: i32, %arg1: memref<128x64xbf16, #tpu.memory_space<vmem>>, %arg2: memref<64x128xbf16, #tpu.memory_space<vmem>>, %arg3: memref<1x128xf32, #tpu.memory_space<vmem>>, %arg4: memref<128x128xbf16, #tpu.memory_space<vmem>>) attributes {dimension_semantics = [#tpu.dimension_semantics<parallel>], iteration_bounds = array<i64: 1>, scalar_prefetch = 0 : i64, scratch_operands = 0 : i64, tpu.core_type = #tpu.core_type<tc>, window_params = [{transform_indices = @transform_0, window_bounds = array<i64: 128, 64>}, {pipeline_mode = #tpu.pipeline_mode<synchronous>, transform_indices = @transform_1, window_bounds = array<i64: 64, 128>}, {pipeline_mode = #tpu.pipeline_mode<synchronous>, transform_indices = @transform_2, window_bounds = array<i64: 1, 128>}, {transform_indices = @transform_3, window_bounds = array<i64: 128, 128>}]} {
    %c0 = arith.constant 0 : index
    %c0_0 = arith.constant 0 : index
    %0 = vector.load %arg1[%c0, %c0_0] : memref<128x64xbf16, #tpu.memory_space<vmem>>, vector<128x64xbf16>
    %c0_1 = arith.constant 0 : index
    %c0_2 = arith.constant 0 : index
    %1 = vector.load %arg2[%c0_1, %c0_2] : memref<64x128xbf16, #tpu.memory_space<vmem>>, vector<64x128xbf16>
    %cst = arith.constant dense<0.000000e+00> : vector<128x128xf32>
    %2 = tpu.matmul %0, %1, %cst {dimension_numbers = #tpu.dot_dimension_numbers<[1], [0], [0], [1], [0, 0, 1, 1], [], []>} : vector<128x64xbf16>, vector<64x128xbf16>, vector<128x128xf32> -> vector<128x128xf32>
    %c0_3 = arith.constant 0 : index
    %c0_4 = arith.constant 0 : index
    %3 = vector.load %arg3[%c0_3, %c0_4] : memref<1x128xf32, #tpu.memory_space<vmem>>, vector<1x128xf32>
    %4 = vector.broadcast %3 : vector<1x128xf32> to vector<128x128xf32>
    %5 = arith.addf %2, %4 : vector<128x128xf32>
    %cst_5 = arith.constant 0.000000e+00 : f32
    %6 = vector.broadcast %cst_5 : f32 to vector<128x128xf32>
    %7 = arith.cmpf ogt, %5, %6 : vector<128x128xf32>
    %cst_6 = arith.constant 0.00999999977 : f32
    %8 = vector.broadcast %cst_6 : f32 to vector<128x128xf32>
    %9 = arith.mulf %8, %5 : vector<128x128xf32>
    %10 = arith.select %7, %5, %9 : vector<128x128xi1>, vector<128x128xf32>
    %11 = arith.truncf %10 : vector<128x128xf32> to vector<128x128xbf16>
    %c0_7 = arith.constant 0 : index
    %c0_8 = arith.constant 0 : index
    %12 = vector.load %arg4[%c0_7, %c0_8] : memref<128x128xbf16, #tpu.memory_space<vmem>>, vector<128x128xbf16>
    tpu.vector_store %arg4[%c0_7, %c0_8], %11 {strides = array<i32>} : memref<128x128xbf16, #tpu.memory_space<vmem>>, vector<128x128xbf16>,
    return
  }
  func.func @transform_0(%arg0: i32) -> (i32, i32) {
    %c0_i32 = arith.constant 0 : i32
    %c0_i32_0 = arith.constant 0 : i32
    return %arg0, %c0_i32 : i32, i32
  }
  func.func @transform_1(%arg0: i32) -> (i32, i32) {
    %c0_i32 = arith.constant 0 : i32
    %c0_i32_0 = arith.constant 0 : i32
    %c0_i32_1 = arith.constant 0 : i32
    return %c0_i32, %c0_i32_0 : i32, i32
  }
  func.func @transform_2(%arg0: i32) -> (i32, i32) {
    %c0_i32 = arith.constant 0 : i32
    %c0_i32_0 = arith.constant 0 : i32
    %c0_i32_1 = arith.constant 0 : i32
    return %c0_i32, %c0_i32_0 : i32, i32
  }
  func.func @transform_3(%arg0: i32) -> (i32, i32) {
    %c0_i32 = arith.constant 0 : i32
    %c0_i32_0 = arith.constant 0 : i32
    return %arg0, %c0_i32 : i32, i32
  }
}

module attributes {stable_mosaic.version = 11 : i64} {
  func.func @_mm_bias_act_kernel(%arg0: i32, %arg1: memref<256x144xbf16, #tpu.memory_space<vmem>>, %arg2: memref<144x128xbf16, #tpu.memory_space<vmem>>, %arg3: memref<1x128xf32, #tpu.memory_space<vmem>>, %arg4: memref<256x128xbf16, #tpu.memory_space<vmem>>) attributes {dimension_semantics = [#tpu.dimension_semantics<parallel>], iteration_bounds = array<i64: 2>, scalar_prefetch = 0 : i64, scratch_operands = 0 : i64, tpu.core_type = #tpu.core_type<tc>, window_params = [{transform_indices = @transform_0, window_bounds = array<i64: 256, 144>}, {pipeline_mode = #tpu.pipeline_mode<synchronous>, transform_indices = @transform_1, window_bounds = array<i64: 144, 128>}, {pipeline_mode = #tpu.pipeline_mode<synchronous>, transform_indices = @transform_2, window_bounds = array<i64: 1, 128>}, {transform_indices = @transform_3, window_bounds = array<i64: 256, 128>}]} {
    %c0 = arith.constant 0 : index
    %c0_0 = arith.constant 0 : index
    %0 = vector.load %arg1[%c0, %c0_0] : memref<256x144xbf16, #tpu.memory_space<vmem>>, vector<256x144xbf16>
    %c0_1 = arith.constant 0 : index
    %c0_2 = arith.constant 0 : index
    %1 = vector.load %arg2[%c0_1, %c0_2] : memref<144x128xbf16, #tpu.memory_space<vmem>>, vector<144x128xbf16>
    %cst = arith.constant dense<0.000000e+00> : vector<256x128xf32>
    %2 = tpu.matmul %0, %1, %cst {dimension_numbers = #tpu.dot_dimension_numbers<[1], [0], [0], [1], [0, 0, 1, 1], [], []>} : vector<256x144xbf16>, vector<144x128xbf16>, vector<256x128xf32> -> vector<256x128xf32>
    %c0_3 = arith.constant 0 : index
    %c0_4 = arith.constant 0 : index
    %3 = vector.load %arg3[%c0_3, %c0_4] : memref<1x128xf32, #tpu.memory_space<vmem>>, vector<1x128xf32>
    %4 = vector.broadcast %3 : vector<1x128xf32> to vector<256x128xf32>
    %5 = arith.addf %2, %4 : vector<256x128xf32>
    %6 = arith.negf %5 : vector<256x128xf32>
    %7 = math.exp %6 : vector<256x128xf32>
    %cst_5 = arith.constant 1.000000e+00 : f32
    %8 = vector.broadcast %cst_5 : f32 to vector<256x128xf32>
    %9 = arith.addf %8, %7 : vector<256x128xf32>
    %10 = arith.divf %8, %9 : vector<256x128xf32>
    %11 = arith.truncf %10 : vector<256x128xf32> to vector<256x128xbf16>
    %c0_6 = arith.constant 0 : index
    %c0_7 = arith.constant 0 : index
    %12 = vector.load %arg4[%c0_6, %c0_7] : memref<256x128xbf16, #tpu.memory_space<vmem>>, vector<256x128xbf16>
    tpu.vector_store %arg4[%c0_6, %c0_7], %11 {strides = array<i32>} : memref<256x128xbf16, #tpu.memory_space<vmem>>, vector<256x128xbf16>,
    return
  }
  func.func @transform_0(%arg0: i32) -> (i32, i32) {
    %c0_i32 = arith.constant 0 : i32
    %c0_i32_0 = arith.constant 0 : i32
    return %arg0, %c0_i32 : i32, i32
  }
  func.func @transform_1(%arg0: i32) -> (i32, i32) {
    %c0_i32 = arith.constant 0 : i32
    %c0_i32_0 = arith.constant 0 : i32
    %c0_i32_1 = arith.constant 0 : i32
    return %c0_i32, %c0_i32_0 : i32, i32
  }
  func.func @transform_2(%arg0: i32) -> (i32, i32) {
    %c0_i32 = arith.constant 0 : i32
    %c0_i32_0 = arith.constant 0 : i32
    %c0_i32_1 = arith.constant 0 : i32
    return %c0_i32, %c0_i32_0 : i32, i32
  }
  func.func @transform_3(%arg0: i32) -> (i32, i32) {
    %c0_i32 = arith.constant 0 : i32
    %c0_i32_0 = arith.constant 0 : i32
    return %arg0, %c0_i32 : i32, i32
  }
}

</mosaic_0001>

<bundles_post_ra>
// kernel: vae_forward.6
= control target key start
LH: loop header
LB: loop body
LE: loop exit
PB: predicated region body
PF: predicated region fallthrough
CT: control target
= control target key end

     0   :  { %vm94_vm0 = vcmask 261120   ;;  %s597_s1 = inlined_call_operand.vmem [shape: bf16[32,128], index: 1, kind: input, shape index: {}]   ;;  %s598_s0 = inlined_call_operand.vmem [shape: bf16[128,32], index: 0, kind: input, shape index: {}]   ;;  %s599_s2 = inlined_call_operand.vmem [shape: f32[1,128], index: 2, kind: input, shape index: {}]   ;;  %s600_s3 = inlined_call_operand.vmem [shape: bf16[128,128], index: 3, kind: output, shape index: {}]  }
   0x1   :  { %v480_v0 = vld [vmem:[%s597_s1] sm:$0xff]   ;;  %v481_v1 = vld [vmem:[%s597_s1 + $0x8] sm:$0xff]   ;;  %v486_v6 = vld [vmem:[%s598_s0 + $0x10] sm:$0xff]  }
   0x2   :  { %456 = vmatprep.subr.bf16.mxu0 %v480_v0  ;;  %476 = vmatprep.subr.bf16.mxu1 %v480_v0  ;;  %v482_v2 = vld [vmem:[%s598_s0] sm:$0xff]   ;;  %v484_v4 = vld [vmem:[%s598_s0 + $0x8] sm:$0xff]   ;;  %v487_v7 = vld [vmem:[%s598_s0 + $0x30] sm:$0xff]  }
   0x3   :  { %457 = vmatpush3.bf16.msra.mxu0 %v480_v0  ;;  %478 = vmatpush3.bf16.msra.mxu1 %v480_v0  ;;  %v483_v3 = vld [vmem:[%s598_s0 + $0x20] sm:$0xff]   ;;  %v485_v5 = vld [vmem:[%s598_s0 + $0x28] sm:$0xff]   ;;  %v488_v8 = vld [vmem:[%s598_s0 + $0x18] sm:$0xff]  }
   0x4   :  { %458 = vmatprep.subr.bf16.mxu0 %v481_v1  ;;  %477 = vmatprep.subr.bf16.mxu1 %v481_v1  ;;  %v489_v9 = vld [vmem:[%s598_s0 + $0x38] sm:$0xff]   ;;  %v551_v10 = vld [vmem:[%s599_s2] ss:$0 sm:$0xff] }
   0x5   :  { %460 = vmatprep.mubr.msk.bf16.mxu0 %vm94_vm0, %v482_v2  ;;  %468 = vmatprep.mubr.msk.bf16.mxu1 %vm94_vm0, %v483_v3 }
   0x7   :  { %459 = vmatpush3.bf16.msra.mxu0 %v481_v1  ;;  %479 = vmatpush3.bf16.msra.mxu1 %v481_v1 }
   0xa   :  { %461 = vmatmul.mubr.msk.bf16.vlgmr.msra.gmra.mrb[0].mxu0 %vm94_vm0, %v484_v4  ;;  %469 = vmatmul.mubr.msk.bf16.vlgmr.msra.gmra.mrb[0].mxu1 %vm94_vm0, %v485_v5 }
   0xb   :  { %464 = vmatprep.mubr.msk.bf16.mxu0 %vm94_vm0, %v486_v6  ;;  %472 = vmatprep.mubr.msk.bf16.mxu1 %vm94_vm0, %v487_v7 }
  0x12   :  { %465 = vmatmul.mubr.msk.bf16.gmra.mrb[4].mxu0 %vm94_vm0, %v488_v8  ;;  %473 = vmatmul.mubr.msk.bf16.gmra.mrb[4].mxu1 %vm94_vm0, %v489_v9 }
  0xdd   :  { %v462_v11 = vpop.f32.mrb[0].mxu0  ;;  %v470_v12 = vpop.f32.mrb[0].mxu1 }
  0xde   :  { %v162_v13 = vadd.f32 %v462_v11, %v551_v10  ;;  %v194_v14 = vadd.f32 %v470_v12, %v551_v10  ;;  %v153_v15 = vpop.f32.mrb[1].mxu0  ;;  %v185_v16 = vpop.f32.mrb[1].mxu1 }
  0xdf   :  { %v154_v17 = vadd.f32 %v551_v10, %v153_v15  ;;  %v186_v18 = vadd.f32 %v551_v10, %v185_v16  ;;  %v463_v19 = vpop.f32.mrb[2].mxu0  ;;  %v471_v20 = vpop.f32.mrb[2].mxu1 }
  0xe0   :  { %vm218_vm1 = vcmp.gt.f32.partialorder %v162_v13, 0.0  ;;  %v234_v21 = vmul.f32 0.01, %v162_v13  ;;  %vm226_vm2 = vcmp.gt.f32.partialorder %v194_v14, 0.0  ;;  %v242_v22 = vmul.f32 0.01, %v194_v14 }
  0xe1   :  { %vm216_vm3 = vcmp.gt.f32.partialorder %v154_v17, 0.0  ;;  %v232_v23 = vmul.f32 0.01, %v154_v17  ;;  %vm224_vm4 = vcmp.gt.f32.partialorder %v186_v18, 0.0  ;;  %v240_v24 = vmul.f32 0.01, %v186_v18 }
  0xe2   :  { %v165_v25 = vadd.f32 %v463_v19, %v551_v10  ;;  %v197_v26 = vadd.f32 %v471_v20, %v551_v10  ;;  %v156_v27 = vpop.f32.mrb[3].mxu0  ;;  %v188_v28 = vpop.f32.mrb[3].mxu1  ;;  %v250_v29 = vsel %vm218_vm1, %v162_v13, %v234_v21  ;;  %v258_v30 = vsel %vm226_vm2, %v194_v14, %v242_v22 }
  0xe3   :  { %v157_v31 = vadd.f32 %v551_v10, %v156_v27  ;;  %v189_v32 = vadd.f32 %v551_v10, %v188_v28  ;;  %v248_v37 = vsel %vm216_vm3, %v154_v17, %v232_v23  ;;  %v256_v38 = vsel %vm224_vm4, %v186_v18, %v240_v24 }
  0xe4   :  { %vm219_vm5 = vcmp.gt.f32.partialorder %v165_v25, 0.0  ;;  %v235_v33 = vmul.f32 0.01, %v165_v25  ;;  %vm227_vm6 = vcmp.gt.f32.partialorder %v197_v26, 0.0  ;;  %v243_v34 = vmul.f32 0.01, %v197_v26 }
  0xe5   :  { %vm217_vm7 = vcmp.gt.f32.partialorder %v157_v31, 0.0  ;;  %v233_v35 = vmul.f32 0.01, %v157_v31  ;;  %vm225_vm8 = vcmp.gt.f32.partialorder %v189_v32, 0.0  ;;  %v241_v36 = vmul.f32 0.01, %v189_v32 }
  0xe6   :  { %v251_v39 = vsel %vm219_vm5, %v165_v25, %v235_v33  ;;  %v259_v40 = vsel %vm227_vm6, %v197_v26, %v243_v34  ;;  %v466_v41 = vpop.f32.mrb[4].mxu0  ;;  %v474_v42 = vpop.f32.mrb[4].mxu1 }
  0xe7   :  { %v407_v43 = vpack.c.bf16 %v251_v39, %v250_v29  ;;  %v427_v44 = vpack.c.bf16 %v259_v40, %v258_v30  ;;  %v249_v45 = vsel %vm217_vm7, %v157_v31, %v233_v35  ;;  %v257_v46 = vsel %vm225_vm8, %v189_v32, %v241_v36  ;;  %v169_v47 = vpop.f32.mrb[5].mxu0  ;;  %v201_v48 = vpop.f32.mrb[5].mxu1 }
  0xe8   :  { %v402_v49 = vpack.c.bf16 %v249_v45, %v248_v37  ;;  %v422_v50 = vpack.c.bf16 %v257_v46, %v256_v38  ;;  %v178_v51 = vadd.f32 %v466_v41, %v551_v10  ;;  %v210_v52 = vadd.f32 %v474_v42, %v551_v10  ;;  %v467_v53 = vpop.f32.mrb[6].mxu0  ;;  %v475_v54 = vpop.f32.mrb[6].mxu1 }
  0xe9   :  { %439 = vst [vmem:[%s600_s3 + $0x8] sm:$0xff] %v407_v43   ;;  %443 = vst [vmem:[%s600_s3 + $0x28] sm:$0xff] %v427_v44   ;;  %v170_v55 = vadd.f32 %v551_v10, %v169_v47  ;;  %v202_v56 = vadd.f32 %v551_v10, %v201_v48  ;;  %v181_v57 = vadd.f32 %v467_v53, %v551_v10  ;;  %v172_v59 = vpop.f32.mrb[7].mxu0  ;;  %v204_v60 = vpop.f32.mrb[7].mxu1 }
  0xea   :  { %v213_v58 = vadd.f32 %v475_v54, %v551_v10  ;;  %403 = vst [vmem:[%s600_s3] sm:$0xff] %v402_v49   ;;  %442 = vst [vmem:[%s600_s3 + $0x20] sm:$0xff] %v422_v50   ;;  %v238_v61 = vmul.f32 0.01, %v178_v51  ;;  %vm222_vm9 = vcmp.gt.f32.partialorder %v178_v51, 0.0  ;;  %v246_v62 = vmul.f32 0.01, %v210_v52 }
  0xeb   :  { %vm230_vm10 = vcmp.gt.f32.partialorder %v210_v52, 0.0  ;;  %vm220_vm11 = vcmp.gt.f32.partialorder %v170_v55, 0.0  ;;  %vm223_vm12 = vcmp.gt.f32.partialorder %v181_v57, 0.0  ;;  %v239_v63 = vmul.f32 0.01, %v181_v57 }
  0xec   :  { %v236_v0 = vmul.f32 0.01, %v170_v55  ;;  %vm228_vm13 = vcmp.gt.f32.partialorder %v202_v56, 0.0  ;;  %vm231_vm14 = vcmp.gt.f32.partialorder %v213_v58, 0.0  ;;  %v247_v1 = vmul.f32 0.01, %v213_v58 }
  0xed   :  { %v254_v2 = vsel %vm222_vm9, %v178_v51, %v238_v61  ;;  %v255_v3 = vsel %vm223_vm12, %v181_v57, %v239_v63  ;;  %v173_v4 = vadd.f32 %v551_v10, %v172_v59  ;;  %v205_v5 = vadd.f32 %v551_v10, %v204_v60 }
  0xee   :  { %v262_v6 = vsel %vm230_vm10, %v210_v52, %v246_v62  ;;  %v244_v7 = vmul.f32 0.01, %v202_v56  ;;  %v417_v8 = vpack.c.bf16 %v255_v3, %v254_v2  ;;  %v263_v9 = vsel %vm231_vm14, %v213_v58, %v247_v1 }
  0xef   :  { %v437_v11 = vpack.c.bf16 %v263_v9, %v262_v6  ;;  %vm221_vm15 = vcmp.gt.f32.partialorder %v173_v4, 0.0  ;;  %v237_v12 = vmul.f32 0.01, %v173_v4  ;;  %vm229_vm0 = vcmp.gt.f32.partialorder %v205_v5, 0.0 }
  0xf0   :  { %441 = vst [vmem:[%s600_s3 + $0x18] sm:$0xff] %v417_v8   ;;  %v245_v13 = vmul.f32 0.01, %v205_v5  ;;  %v252_v14 = vsel %vm220_vm11, %v170_v55, %v236_v0  ;;  %v260_v15 = vsel %vm228_vm13, %v202_v56, %v244_v7 }
  0xf1   :  { %445 = vst [vmem:[%s600_s3 + $0x38] sm:$0xff] %v437_v11   ;;  %v253_v10 = vsel %vm221_vm15, %v173_v4, %v237_v12 }
  0xf2   :  { %v412_v16 = vpack.c.bf16 %v253_v10, %v252_v14  ;;  %v261_v17 = vsel %vm229_vm0, %v205_v5, %v245_v13 }
  0xf3   :  { %v432_v18 = vpack.c.bf16 %v261_v17, %v260_v15 }
  0xf4   :  { %440 = vst [vmem:[%s600_s3 + $0x10] sm:$0xff] %v412_v16  }
  0xf5   :  { %444 = vst [vmem:[%s600_s3 + $0x30] sm:$0xff] %v432_v18  }

// kernel: vae_forward.7
= control target key start
LH: loop header
LB: loop body
LE: loop exit
PB: predicated region body
PF: predicated region fallthrough
CT: control target
= control target key end

     0   :  { %v277_v0 = vmov 0   ;;  %vm116_vm0 = vcmask 130048   ;;  %s346_s1 = inlined_call_operand.vmem [shape: bf16[144,128], index: 1, kind: input, shape index: {}]   ;;  %s347_s0 = inlined_call_operand.vmem [shape: bf16[32,144], index: 0, kind: input, shape index: {}]   ;;  %s348_s2 = inlined_call_operand.vmem [shape: f32[1,128], index: 2, kind: input, shape index: {}]   ;;  %s349_s3 = inlined_call_operand.vmem [shape: bf16[32,128], index: 3, kind: output, shape index: {}]  }
   0x1   :  { %123 = vmatprep.subr.bf16.mxu0 %v277_v0  ;;  %243 = vmatprep.subr.bf16.mxu1 %v277_v0  ;;  %v262_v1 = vld [vmem:[%s346_s1] sm:$0xff]   ;;  %v263_v2 = vld [vmem:[%s346_s1 + $0x8] sm:$0xff]   ;;  %v264_v3 = vld [vmem:[%s346_s1 + $0x10] sm:$0xff]  }
   0x2   :  { %124 = vmatpush1.bf16.msra.mxu0 %v262_v1  ;;  %252 = vmatpush1.bf16.msra.mxu1 %v262_v1  ;;  %v265_v4 = vld [vmem:[%s346_s1 + $0x18] sm:$0xff]   ;;  %v273_v5 = vld [vmem:[%s347_s0 + $0x4] ss:$8 sps:$4 sm:$0xff]   ;;  %v268_v9 = vld [vmem:[%s346_s1 + $0x30] sm:$0xff]  }
   0x3   :  { %125 = vmatprep.subr.bf16.mxu0 %v277_v0  ;;  %244 = vmatprep.subr.bf16.mxu1 %v277_v0  ;;  %v276_v6 = vld [vmem:[%s347_s0 + $0x14] ss:$8 sps:$4 sm:$0xff]   ;;  %v266_v7 = vld [vmem:[%s346_s1 + $0x20] sm:$0xff]   ;;  %v267_v8 = vld [vmem:[%s346_s1 + $0x28] sm:$0xff]  }
   0x4   :  { %222 = vmatprep.mubr.msk.bf16.mxu0 %vm116_vm0, %v273_v5  ;;  %223 = vmatprep.mubr.msk.bf16.mxu1 %vm116_vm0, %v276_v6  ;;  %v269_v10 = vld [vmem:[%s346_s1 + $0x38] sm:$0xff]   ;;  %v270_v11 = vld [vmem:[%s346_s1 + $0x40] sm:$0xff]  }
   0x5   :  { %v271_v12 = vld [vmem:[%s347_s0] ss:$8 sps:$4 sm:$0xff]   ;;  %v274_v13 = vld [vmem:[%s347_s0 + $0x10] ss:$8 sps:$4 sm:$0xff]  }
   0x6   :  { %126 = vmatpush1.bf16.msra.mxu0 %v263_v2  ;;  %253 = vmatpush1.bf16.msra.mxu1 %v263_v2  ;;  %v208_v14 = vld [vmem:[%s348_s2] ss:$0 sm:$0xff] }
   0x7   :  { %127 = vmatprep.subr.bf16.mxu0 %v277_v0  ;;  %245 = vmatprep.subr.bf16.mxu1 %v277_v0 }
   0xa   :  { %128 = vmatpush1.bf16.msra.mxu0 %v264_v3  ;;  %254 = vmatpush1.bf16.msra.mxu1 %v264_v3 }
   0xb   :  { %129 = vmatprep.subr.bf16.mxu0 %v277_v0  ;;  %246 = vmatprep.subr.bf16.mxu1 %v277_v0 }
   0xe   :  { %130 = vmatpush1.bf16.msra.mxu0 %v265_v4  ;;  %255 = vmatpush1.bf16.msra.mxu1 %v265_v4 }
   0xf   :  { %131 = vmatprep.subr.bf16.mxu0 %v277_v0  ;;  %247 = vmatprep.subr.bf16.mxu1 %v277_v0 }
  0x12   :  { %132 = vmatpush1.bf16.msra.mxu0 %v266_v7  ;;  %256 = vmatpush1.bf16.msra.mxu1 %v266_v7 }
  0x13   :  { %133 = vmatprep.subr.bf16.mxu0 %v277_v0  ;;  %248 = vmatprep.subr.bf16.mxu1 %v277_v0 }
  0x16   :  { %134 = vmatpush1.bf16.msra.mxu0 %v267_v8  ;;  %257 = vmatpush1.bf16.msra.mxu1 %v267_v8 }
  0x17   :  { %135 = vmatprep.subr.bf16.mxu0 %v277_v0  ;;  %249 = vmatprep.subr.bf16.mxu1 %v277_v0 }
  0x1a   :  { %136 = vmatpush1.bf16.msra.mxu0 %v268_v9  ;;  %258 = vmatpush1.bf16.msra.mxu1 %v268_v9 }
  0x1b   :  { %137 = vmatprep.subr.bf16.mxu0 %v277_v0  ;;  %250 = vmatprep.subr.bf16.mxu1 %v277_v0 }
  0x1e   :  { %138 = vmatpush1.bf16.msra.mxu0 %v269_v10  ;;  %259 = vmatpush1.bf16.msra.mxu1 %v269_v10 }
  0x1f   :  { %139 = vmatprep.subr.bf16.mxu0 %v277_v0  ;;  %251 = vmatprep.subr.bf16.mxu1 %v277_v0 }
  0x22   :  { %140 = vmatpush1.bf16.msra.mxu0 %v270_v11  ;;  %260 = vmatpush1.bf16.msra.mxu1 %v270_v11 }
  0x25   :  { %156 = vmatmul.mubr.bf16.vlgmr.msra.gmra.mrb[0].mxu0 %v271_v12  ;;  %164 = vmatmul.mubr.bf16.vlgmr.msra.gmra.mrb[0].mxu1 %v274_v13 }
  0xf8   :  { %v157_v15 = vpop.f32.mrb[0].mxu0  ;;  %v165_v16 = vpop.f32.mrb[0].mxu1 }
  0xf9   :  { %v158_v17 = vadd.f32 %v208_v14, %v157_v15  ;;  %v166_v18 = vadd.f32 %v208_v14, %v165_v16  ;;  %v159_v19 = vpop.f32.mrb[1].mxu0  ;;  %v167_v20 = vpop.f32.mrb[1].mxu1 }
  0xfa   :  { %v160_v21 = vpop.f32.mrb[2].mxu0  ;;  %v168_v22 = vpop.f32.mrb[2].mxu1 }
  0xfb   :  { %v176_v23 = vmul.f32 0.01, %v158_v17  ;;  %v178_v24 = vmul.f32 0.01, %v166_v18  ;;  %v161_v25 = vadd.f32 %v208_v14, %v160_v21  ;;  %v169_v26 = vadd.f32 %v208_v14, %v168_v22  ;;  %v162_v27 = vpop.f32.mrb[3].mxu0  ;;  %v170_v28 = vpop.f32.mrb[3].mxu1 }
  0xfc   :  { %vm172_vm1 = vcmp.gt.f32.partialorder %v158_v17, 0.0  ;;  %vm174_vm2 = vcmp.gt.f32.partialorder %v166_v18, 0.0 }
  0xfd   :  { %vm173_vm3 = vcmp.gt.f32.partialorder %v161_v25, 0.0  ;;  %v177_v29 = vmul.f32 0.01, %v161_v25  ;;  %vm175_vm4 = vcmp.gt.f32.partialorder %v169_v26, 0.0  ;;  %v179_v30 = vmul.f32 0.01, %v169_v26 }
  0xfe   :  { %v180_v31 = vsel %vm172_vm1, %v158_v17, %v176_v23  ;;  %v182_v32 = vsel %vm174_vm2, %v166_v18, %v178_v24 }
  0xff   :  { %v181_v33 = vsel %vm173_vm3, %v161_v25, %v177_v29  ;;  %v183_v34 = vsel %vm175_vm4, %v169_v26, %v179_v30 }
 0x100   :  { %v235_v35 = vpack.c.bf16 %v181_v33, %v180_v31  ;;  %v240_v36 = vpack.c.bf16 %v183_v34, %v182_v32 }
 0x102   :  { %236 = vst [vmem:[%s349_s3] sm:$0xff] %v235_v35   ;;  %242 = vst [vmem:[%s349_s3 + $0x8] sm:$0xff] %v240_v36  }

// kernel: vae_forward.8
= control target key start
LH: loop header
LB: loop body
LE: loop exit
PB: predicated region body
PF: predicated region fallthrough
CT: control target
= control target key end

     0   :  { %s710_s25 = smov 8   ;;  %vm438_vm0 = vcmask 1043456   ;;  %v711_v62 = vmov 0   ;;  %vm434_vm1 = vcmask 64512   ;;  %s879_s1 = inlined_call_operand.vmem [shape: bf16[512,128], index: 1, kind: input, shape index: {}]   ;;  %s880_s0 = inlined_call_operand.vmem [shape: bf16[8,512], index: 0, kind: input, shape index: {}]   ;;  %s881_s3 = inlined_call_operand.vmem [shape: f32[8,8], index: 3, kind: input, shape index: {}]   ;;  %s882_s4 = inlined_call_operand.vmem [shape: bf16[8,512], index: 4, kind: input, shape index: {}]   ;;  %s883_s2 = inlined_call_operand.vmem [shape: f32[1,128], index: 2, kind: input, shape index: {}]   ;;  %s884_s6 = inlined_call_operand.vmem [shape: f32[8,128], index: 6, kind: output, shape index: {0}]   ;;  %s885_s5 = inlined_call_operand.vmem [shape: f32[1,512], index: 5, kind: input, shape index: {}]   ;;  %s886_s7 = inlined_call_operand.vmem [shape: bf16[8,512], index: 7, kind: output, shape index: {1}]  }
   0x1   :  { %v668_v0 = vld [vmem:[%s879_s1 + $0x40] sm:$0xff]   ;;  %v672_v4 = vld [vmem:[%s879_s1 + $0x48] sm:$0xff]   ;;  %v676_v8 = vld [vmem:[%s879_s1 + $0x50] sm:$0xff]  }
   0x2   :  { %v669_v1 = vld [vmem:[%s879_s1 + $0xc0] sm:$0xff]   ;;  %621 = vmatprep.subr.bf16.mxu0 %v668_v0  ;;  %v673_v5 = vld [vmem:[%s879_s1 + $0xc8] sm:$0xff]   ;;  %v677_v9 = vld [vmem:[%s879_s1 + $0xd0] sm:$0xff]  }
   0x3   :  { %v670_v2 = vld [vmem:[%s879_s1] sm:$0xff]   ;;  %643 = vmatprep.subr.bf16.mxu1 %v669_v1  ;;  %v674_v6 = vld [vmem:[%s879_s1 + $0x8] sm:$0xff]   ;;  %v678_v10 = vld [vmem:[%s879_s1 + $0x10] sm:$0xff]  }
   0x4   :  { %v671_v3 = vld [vmem:[%s879_s1 + $0x80] sm:$0xff]   ;;  %622 = vmatpush3.bf16.msra.mxu0 %v670_v2  ;;  %v675_v7 = vld [vmem:[%s879_s1 + $0x88] sm:$0xff]   ;;  %v679_v11 = vld [vmem:[%s879_s1 + $0x90] sm:$0xff]  }
   0x5   :  { %644 = vmatpush3.bf16.msra.mxu1 %v671_v3  ;;  %623 = vmatprep.subr.bf16.mxu0 %v672_v4  ;;  %v680_v12 = vld [vmem:[%s879_s1 + $0x58] sm:$0xff]   ;;  %v684_v16 = vld [vmem:[%s879_s1 + $0x60] sm:$0xff]   ;;  %v688_v20 = vld [vmem:[%s879_s1 + $0x68] sm:$0xff]  }
   0x6   :  { %645 = vmatprep.subr.bf16.mxu1 %v673_v5  ;;  %v681_v13 = vld [vmem:[%s879_s1 + $0xd8] sm:$0xff]   ;;  %v685_v17 = vld [vmem:[%s879_s1 + $0xe0] sm:$0xff]   ;;  %v689_v21 = vld [vmem:[%s879_s1 + $0xe8] sm:$0xff]   ;;  %v404_v5 = vlaneseq }
   0x7   :  { %v682_v14 = vld [vmem:[%s879_s1 + $0x18] sm:$0xff]   ;;  %v686_v18 = vld [vmem:[%s879_s1 + $0x20] sm:$0xff]   ;;  %v690_v22 = vld [vmem:[%s879_s1 + $0x28] sm:$0xff]  }
   0x8   :  { %624 = vmatpush3.bf16.msra.mxu0 %v674_v6  ;;  %v683_v15 = vld [vmem:[%s879_s1 + $0x98] sm:$0xff]   ;;  %v687_v19 = vld [vmem:[%s879_s1 + $0xa0] sm:$0xff]   ;;  %v691_v23 = vld [vmem:[%s879_s1 + $0xa8] sm:$0xff]   ;;  %v405_v6 = vshrl.u32 %v404_v5, 7 }
   0x9   :  { %646 = vmatpush3.bf16.msra.mxu1 %v675_v7  ;;  %625 = vmatprep.subr.bf16.mxu0 %v676_v8  ;;  %v692_v24 = vld [vmem:[%s879_s1 + $0x70] sm:$0xff]   ;;  %v696_v28 = vld [vmem:[%s879_s1 + $0x78] sm:$0xff]   ;;  %v26_v32 = vld [vmem:[%s880_s0] sm:$0xff] }
   0xa   :  { %647 = vmatprep.subr.bf16.mxu1 %v677_v9  ;;  %v693_v25 = vld [vmem:[%s879_s1 + $0xf0] sm:$0xff]   ;;  %v697_v29 = vld [vmem:[%s879_s1 + $0xf8] sm:$0xff]   ;;  %v27_v33 = vld [vmem:[%s880_s0 + $0x8] sm:$0xff]  ;;  %v573_v35 = vcombine.low %v26_v32, %v26_v32  ;;  %v574_v36 = vcombine.high %v26_v32, %v26_v32  ;;  %v406_v7 = vsub.s32 0, %v405_v6  ;;  %v414_v8 = vsub.s32 2, %v405_v6 }
   0xb   :  { %v694_v26 = vld [vmem:[%s879_s1 + $0x30] sm:$0xff]   ;;  %v698_v30 = vld [vmem:[%s879_s1 + $0x38] sm:$0xff]   ;;  %v388_v34 = vld [vmem:[%s881_s3] sm:$0xff]  ;;  %v575_v37 = vcombine.low %v27_v33, %v27_v33  ;;  %v576_v38 = vcombine.high %v27_v33, %v27_v33 }
   0xc   :  { %626 = vmatpush3.bf16.msra.mxu0 %v678_v10  ;;  %v695_v27 = vld [vmem:[%s879_s1 + $0xb0] sm:$0xff]   ;;  %v699_v31 = vld [vmem:[%s879_s1 + $0xb8] sm:$0xff]   ;;  %390 = vrot.lane.b32.xlu0 %v388_v34, %s710_s25  ;;  %v400_v39 = vld [vmem:[%s882_s4] sm:$0xff]  ;;  %v410_v10 = vsub.s32 1, %v405_v6 }
   0xd   :  { %648 = vmatpush3.bf16.msra.mxu1 %v679_v11  ;;  %627 = vmatprep.subr.bf16.mxu0 %v680_v12  ;;  %v401_v40 = vld [vmem:[%s882_s4 + $0x8] sm:$0xff]  ;;  %v610_v41 = vcombine.high %v400_v39, %v400_v39  ;;  %v609_v43 = vcombine.low %v400_v39, %v400_v39  ;;  %v572_v49 = vld [vmem:[%s883_s2] ss:$0 sm:$0xff]  ;;  %s712_s2 = smov 120   ;;  %v418_v11 = vsub.s32 3, %v405_v6 }
   0xe   :  { %649 = vmatprep.subr.bf16.mxu1 %v681_v13  ;;  %337 = vmatprep.mubr.bf16.mxu0 %v574_v36  ;;  %v612_v42 = vcombine.high %v401_v40, %v401_v40  ;;  %v611_v44 = vcombine.low %v401_v40, %v401_v40  ;;  %v402_v9 = vld [vmem:[%s885_s5] sm:$0xf] }
   0xf   :  { %377 = vmatprep.mubr.bf16.mxu1 %v576_v38  ;;  %v440_v45 = vsel %vm438_vm0, %v609_v43, 0  ;;  %v407_v12 = vrot.slane %v402_v9, %v406_v7  ;;  %v415_v13 = vrot.slane %v402_v9, %v414_v8 }
  0x10   :  { %628 = vmatpush3.bf16.msra.mxu0 %v682_v14  ;;  %v446_v46 = vsel %vm438_vm0, %v611_v44, 0  ;;  %v411_v14 = vrot.slane %v402_v9, %v410_v10 }
  0x11   :  { %650 = vmatpush3.bf16.msra.mxu1 %v683_v15  ;;  %629 = vmatprep.subr.bf16.mxu0 %v684_v16  ;;  %v419_v15 = vrot.slane %v402_v9, %v418_v11 }
  0x12   :  { %651 = vmatprep.subr.bf16.mxu1 %v685_v17 }
  0x14   :  { %630 = vmatpush3.bf16.msra.mxu0 %v686_v18 }
  0x15   :  { %652 = vmatpush3.bf16.msra.mxu1 %v687_v19  ;;  %631 = vmatprep.subr.bf16.mxu0 %v688_v20 }
  0x16   :  { %653 = vmatprep.subr.bf16.mxu1 %v689_v21 }
  0x18   :  { %632 = vmatpush3.bf16.msra.mxu0 %v690_v22 }
  0x19   :  { %654 = vmatpush3.bf16.msra.mxu1 %v691_v23  ;;  %633 = vmatprep.subr.bf16.mxu0 %v692_v24 }
  0x1a   :  { %655 = vmatprep.subr.bf16.mxu1 %v693_v25 }
  0x1c   :  { %634 = vmatpush3.bf16.msra.mxu0 %v694_v26 }
  0x1d   :  { %656 = vmatpush3.bf16.msra.mxu1 %v695_v27  ;;  %635 = vmatprep.subr.bf16.mxu0 %v696_v28 }
  0x1e   :  { %657 = vmatprep.subr.bf16.mxu1 %v697_v29 }
  0x20   :  { %636 = vmatpush3.bf16.msra.mxu0 %v698_v30 }
  0x21   :  { %658 = vmatpush3.bf16.msra.mxu1 %v699_v31  ;;  %613 = vmatprep.subr.msk.bf16.mxu0 %vm438_vm0, %v610_v41 }
  0x22   :  { %615 = vmatprep.subr.msk.bf16.mxu1 %vm438_vm0, %v612_v42 }
  0x23   :  { %338 = vmatmul.mubr.bf16.vlgmr.msra.gmra.mrb[0].mxu0 %v573_v35 }
  0x24   :  { %378 = vmatmul.mubr.bf16.vlgmr.msra.gmra.mrb[0].mxu1 %v575_v37  ;;  %452 = vmatpush1.bf16.msra.mxu0 %v440_v45 }
  0x25   :  { %493 = vmatpush1.bf16.msra.mxu1 %v446_v46  ;;  %483 = vmatprep.mubr.bf16.mxu0 %v711_v62 }
  0x26   :  { %524 = vmatprep.mubr.bf16.mxu1 %v711_v62 }
  0x7e   :  { %v391_v63 = vpop.permute.xlu0 %390 }
  0xf6   :  { %v637_v47 = vpop.f32.mrb[0].mxu0 }
  0xf7   :  { %v659_v48 = vpop.f32.mrb[0].mxu1  ;;  %v638_v50 = vpop.f32.mrb[1].mxu0 }
  0xf8   :  { %v660_v51 = vpop.f32.mrb[1].mxu1  ;;  %v639_v52 = vadd.f32 %v638_v50, %v637_v47  ;;  %v640_v54 = vpop.f32.mrb[2].mxu0 }
  0xf9   :  { %v661_v53 = vadd.f32 %v660_v51, %v659_v48  ;;  %v662_v55 = vpop.f32.mrb[2].mxu1  ;;  %v641_v56 = vpop.f32.mrb[3].mxu0 }
  0xfa   :  { %v663_v57 = vpop.f32.mrb[3].mxu1  ;;  %v340_v58 = vadd.f32 %v639_v52, %v572_v49 }
  0xfc   :  { %v380_v59 = vadd.f32 %v661_v53, %v340_v58 }
  0xfe   :  { %v385_v60 = vmul.f32 0.5, %v380_v59  ;;  %533 = vst [vmem:[%s884_s6] sm:$0xff] %v380_v59 }
 0x100   :  { %v386_v61 = vmul.f32 1.442695, %v385_v60 }
 0x102   :  { %708 = vpow2.f32 %v386_v61 }
 0x10c   :  { %v709_v0 = vpop.eup %708 }
 0x10d   :  { %v393_v1 = vmul.f32 %v709_v0, %v391_v63 }
 0x10f   :  { %395 = vrot.lane.b32.xlu0 %v393_v1, %s712_s2 }
 0x181   :  { %v396_v2 = vpop.permute.xlu0 %395 }
 0x182   :  { %v398_v3 = vadd.f32 %v396_v2, %v380_v59 }
 0x184   :  { %v399_v4 = vpack.c.bf16 %v398_v3, %v398_v3 }
 0x186   :  { %614 = vmatmul.mubr.msk.bf16.vlgmr.msra.gmra.mrb[4].mxu0 %vm434_vm1, %v399_v4  ;;  %616 = vmatmul.mubr.msk.bf16.vlgmr.msra.gmra.mrb[4].mxu1 %vm434_vm1, %v399_v4 }
 0x259   :  { %v485_v16 = vpop.f32.mrb[4].mxu0  ;;  %v526_v17 = vpop.f32.mrb[4].mxu1 }
 0x25a   :  { %v486_v18 = vadd.f32 %v485_v16, %v407_v12  ;;  %v527_v19 = vadd.f32 %v526_v17, %v415_v13  ;;  %v487_v20 = vpop.f32.mrb[5].mxu0  ;;  %v528_v21 = vpop.f32.mrb[5].mxu1 }
 0x25b   :  { %v488_v22 = vadd.f32 %v487_v20, %v411_v14  ;;  %v529_v23 = vadd.f32 %v528_v21, %v419_v15  ;;  %v489_v24 = vpop.f32.mrb[6].mxu0  ;;  %v530_v25 = vpop.f32.mrb[6].mxu1 }
 0x25c   :  { %vm534_vm2 = vcmp.gt.f32.partialorder %v486_v18, 0.0  ;;  %v538_v26 = vmul.f32 0.01, %v486_v18  ;;  %vm536_vm3 = vcmp.gt.f32.partialorder %v527_v19, 0.0  ;;  %v540_v27 = vmul.f32 0.01, %v527_v19 }
 0x25d   :  { %vm535_vm4 = vcmp.gt.f32.partialorder %v488_v22, 0.0  ;;  %v539_v28 = vmul.f32 0.01, %v488_v22  ;;  %vm537_vm5 = vcmp.gt.f32.partialorder %v529_v23, 0.0  ;;  %v541_v29 = vmul.f32 0.01, %v529_v23 }
 0x25e   :  { %v542_v30 = vsel %vm534_vm2, %v486_v18, %v538_v26  ;;  %v544_v31 = vsel %vm536_vm3, %v527_v19, %v540_v27  ;;  %v490_v32 = vpop.f32.mrb[7].mxu0  ;;  %v531_v33 = vpop.f32.mrb[7].mxu1 }
 0x25f   :  { %v543_v34 = vsel %vm535_vm4, %v488_v22, %v539_v28  ;;  %v545_v35 = vsel %vm537_vm5, %v529_v23, %v541_v29 }
 0x260   :  { %v619_v36 = vpack.c.bf16 %v543_v34, %v542_v30  ;;  %v620_v37 = vpack.c.bf16 %v545_v35, %v544_v31 }
 0x262   :  { %562 = vst [vmem:[%s886_s7] sm:$0xff] %v619_v36  ;;  %563 = vst [vmem:[%s886_s7 + $0x8] sm:$0xff] %v620_v37 }

// kernel: tile.13
= control target key start
LH: loop header
LB: loop body
LE: loop exit
PB: predicated region body
PF: predicated region fallthrough
CT: control target
= control target key end

     0   :  { %s22_s0 = inlined_call_operand.vmem [shape: f32[16], index: 0, kind: input, shape index: {}]   ;;  %s23_s1 = inlined_call_operand.vmem [shape: f32[4,16], index: 1, kind: output, shape index: {}]  }
   0x1   :  { %v4_v0 = vld [vmem:[%s22_s0] ss:$0 sm:$0xff] }
   0x2   :  { %5 = vst [vmem:[%s23_s1] sm:$0xf] %v4_v0 }

// kernel: tile.14
= control target key start
LH: loop header
LB: loop body
LE: loop exit
PB: predicated region body
PF: predicated region fallthrough
CT: control target
= control target key end

     0   :  { %vm7_vm0 = vcmask 130048   ;;  %s37_s8 = smov 16   ;;  %s38_s9 = smov 32   ;;  %vm13_vm1 = vcmask 523648   ;;  %vm19_vm2 = vcmask 392448   ;;  %vm25_vm3 = vcmask 261248   ;;  %s55_s0 = inlined_call_operand.vmem [shape: f32[4,16], index: 0, kind: input, shape index: {}]   ;;  %s56_s1 = inlined_call_operand.vmem [shape: f32[64], index: 1, kind: output, shape index: {}]  }
   0x1   :  { %v4_v0 = vld [vmem:[%s55_s0] sm:$0xf]  ;;  %s36_s0 = smov 48  }
   0x2   :  { %5 = vst [vmem:[#allocation1] sm:$0xf] %v4_v0 }
   0x9   :  { %v10_v1 = vld [vmem:[#allocation1 + $0x3] sm:$0x1]   ;;  %v22_v2 = vld [vmem:[#allocation1 + $0x1] sm:$0x1]   ;;  %v6_v3 = vld [vmem:[#allocation1] sm:$0x1]  }
   0xa   :  { %11 = vrot.lane.b32.xlu0 %v10_v1, %s36_s0  ;;  %23 = vrot.lane.b32.xlu1 %v22_v2, %s37_s8  ;;  %v16_v4 = vld [vmem:[#allocation1 + $0x2] sm:$0x1]   ;;  %8 = vst.msk [vmem:[#allocation0] sm:$0x1] %vm7_vm0, %v6_v3  }
   0xe   :  { %17 = vrot.lane.b32.xlu0 %v16_v4, %s38_s9 }
  0x7c   :  { %v12_v5 = vpop.permute.xlu0 %11   ;;  %v24_v6 = vpop.permute.xlu1 %23  }
  0x7d   :  { %14 = vst.msk [vmem:[#allocation0] sm:$0x1] %vm13_vm1, %v12_v5  }
  0x80   :  { %v18_v7 = vpop.permute.xlu0 %17  }
  0x81   :  { %20 = vst.msk [vmem:[#allocation0] sm:$0x1] %vm19_vm2, %v18_v7  }
  0x82   :  { %26 = vst.msk [vmem:[#allocation0] sm:$0x1] %vm25_vm3, %v24_v6  }
  0x89   :  { %v30_v8 = vld [vmem:[#allocation0] sm:$0x1] }
  0x8a   :  { %32 = vst [vmem:[%s56_s1] sm:$0x1] %v30_v8 }

// kernel: vae_forward.9
= control target key start
LH: loop header
LB: loop body
LE: loop exit
PB: predicated region body
PF: predicated region fallthrough
CT: control target
= control target key end

     0   :  { %s316_s1 = inlined_call_operand.vmem [shape: bf16[128,128], index: 1, kind: input, shape index: {}]   ;;  %s317_s0 = inlined_call_operand.vmem [shape: bf16[32,128], index: 0, kind: input, shape index: {}]   ;;  %s318_s2 = inlined_call_operand.vmem [shape: f32[1,128], index: 2, kind: input, shape index: {}]   ;;  %s319_s3 = inlined_call_operand.vmem [shape: bf16[32,128], index: 3, kind: output, shape index: {}]  }
   0x1   :  { %v247_v0 = vld [vmem:[%s316_s1] sm:$0xff]   ;;  %v248_v1 = vld [vmem:[%s316_s1 + $0x8] sm:$0xff]   ;;  %v249_v2 = vld [vmem:[%s316_s1 + $0x10] sm:$0xff]  }
   0x2   :  { %227 = vmatprep.subr.bf16.mxu0 %v247_v0  ;;  %v250_v3 = vld [vmem:[%s316_s1 + $0x18] sm:$0xff]   ;;  %v255_v4 = vld [vmem:[%s317_s0] sm:$0xff]   ;;  %v252_v6 = vld [vmem:[%s316_s1 + $0x28] sm:$0xff]  }
   0x3   :  { %228 = vmatpush3.bf16.msra.mxu0 %v247_v0  ;;  %243 = vmatprep.mubr.bf16.mxu0 %v255_v4  ;;  %v251_v5 = vld [vmem:[%s316_s1 + $0x20] sm:$0xff]   ;;  %v253_v7 = vld [vmem:[%s316_s1 + $0x30] sm:$0xff]   ;;  %v254_v8 = vld [vmem:[%s316_s1 + $0x38] sm:$0xff]  }
   0x4   :  { %229 = vmatprep.subr.bf16.mxu0 %v248_v1  ;;  %v256_v9 = vld [vmem:[%s317_s0 + $0x8] sm:$0xff]   ;;  %v187_v10 = vld [vmem:[%s318_s2] ss:$0 sm:$0xff] }
   0x7   :  { %230 = vmatpush3.bf16.msra.mxu0 %v248_v1 }
   0x8   :  { %231 = vmatprep.subr.bf16.mxu0 %v249_v2 }
   0xb   :  { %232 = vmatpush3.bf16.msra.mxu0 %v249_v2 }
   0xc   :  { %233 = vmatprep.subr.bf16.mxu0 %v250_v3 }
   0xf   :  { %234 = vmatpush3.bf16.msra.mxu0 %v250_v3 }
  0x10   :  { %235 = vmatprep.subr.bf16.mxu0 %v251_v5 }
  0x13   :  { %236 = vmatpush3.bf16.msra.mxu0 %v251_v5 }
  0x14   :  { %237 = vmatprep.subr.bf16.mxu0 %v252_v6 }
  0x17   :  { %238 = vmatpush3.bf16.msra.mxu0 %v252_v6 }
  0x18   :  { %239 = vmatprep.subr.bf16.mxu0 %v253_v7 }
  0x1b   :  { %240 = vmatpush3.bf16.msra.mxu0 %v253_v7 }
  0x1c   :  { %241 = vmatprep.subr.bf16.mxu0 %v254_v8 }
  0x1f   :  { %242 = vmatpush3.bf16.msra.mxu0 %v254_v8 }
  0x22   :  { %244 = vmatmul.mubr.bf16.vlgmr.msra.gmra.mrb[0].mxu0 %v256_v9 }
  0xf5   :  { %v245_v11 = vpop.f32.mrb[0].mxu0 }
  0xf6   :  { %v145_v12 = vadd.f32 %v245_v11, %v187_v10  ;;  %v136_v13 = vpop.f32.mrb[1].mxu0 }
  0xf7   :  { %v137_v14 = vadd.f32 %v187_v10, %v136_v13  ;;  %v246_v15 = vpop.f32.mrb[2].mxu0 }
  0xf8   :  { %v157_v16 = vmul.f32 0.01, %v145_v12  ;;  %v148_v17 = vadd.f32 %v246_v15, %v187_v10  ;;  %v139_v18 = vpop.f32.mrb[3].mxu0  ;;  %vm153_vm0 = vcmp.gt.f32.partialorder %v145_v12, 0.0 }
  0xf9   :  { %v155_v19 = vmul.f32 0.01, %v137_v14  ;;  %v140_v20 = vadd.f32 %v187_v10, %v139_v18  ;;  %vm151_vm1 = vcmp.gt.f32.partialorder %v137_v14, 0.0 }
  0xfa   :  { %vm154_vm2 = vcmp.gt.f32.partialorder %v148_v17, 0.0  ;;  %v158_v21 = vmul.f32 0.01, %v148_v17  ;;  %v161_v23 = vsel %vm153_vm0, %v145_v12, %v157_v16 }
  0xfb   :  { %vm152_vm3 = vcmp.gt.f32.partialorder %v140_v20, 0.0  ;;  %v156_v22 = vmul.f32 0.01, %v140_v20  ;;  %v159_v25 = vsel %vm151_vm1, %v137_v14, %v155_v19 }
  0xfc   :  { %v162_v24 = vsel %vm154_vm2, %v148_v17, %v158_v21 }
  0xfd   :  { %v214_v26 = vpack.c.bf16 %v162_v24, %v161_v23  ;;  %v160_v27 = vsel %vm152_vm3, %v140_v20, %v156_v22 }
  0xfe   :  { %v209_v28 = vpack.c.bf16 %v160_v27, %v159_v25 }
  0xff   :  { %216 = vst [vmem:[%s319_s3 + $0x8] sm:$0xff] %v214_v26  }
 0x100   :  { %210 = vst [vmem:[%s319_s3] sm:$0xff] %v209_v28  }

// kernel: vae_forward.10
= control target key start
LH: loop header
LB: loop body
LE: loop exit
PB: predicated region body
PF: predicated region fallthrough
CT: control target
= control target key end

     0   :  { %vm110_vm0 = vcmask 523264   ;;  %s633_s1 = inlined_call_operand.vmem [shape: bf16[64,128], index: 1, kind: input, shape index: {}]   ;;  %s634_s0 = inlined_call_operand.vmem [shape: bf16[128,64], index: 0, kind: input, shape index: {}]   ;;  %s635_s2 = inlined_call_operand.vmem [shape: f32[1,128], index: 2, kind: input, shape index: {}]   ;;  %s636_s3 = inlined_call_operand.vmem [shape: bf16[128,128], index: 3, kind: output, shape index: {}]  }
   0x1   :  { %v508_v0 = vld [vmem:[%s633_s1] sm:$0xff]   ;;  %v509_v1 = vld [vmem:[%s633_s1 + $0x8] sm:$0xff]   ;;  %v510_v2 = vld [vmem:[%s633_s1 + $0x10] sm:$0xff]  }
   0x2   :  { %476 = vmatprep.subr.bf16.mxu0 %v508_v0  ;;  %500 = vmatprep.subr.bf16.mxu1 %v508_v0  ;;  %v512_v3 = vld [vmem:[%s634_s0] sm:$0xff]   ;;  %v511_v5 = vld [vmem:[%s633_s1 + $0x18] sm:$0xff]   ;;  %v514_v6 = vld [vmem:[%s634_s0 + $0x8] sm:$0xff]  }
   0x3   :  { %477 = vmatpush3.bf16.msra.mxu0 %v508_v0  ;;  %504 = vmatpush3.bf16.msra.mxu1 %v508_v0  ;;  %v513_v4 = vld [vmem:[%s634_s0 + $0x20] sm:$0xff]   ;;  %v515_v7 = vld [vmem:[%s634_s0 + $0x28] sm:$0xff]   ;;  %v516_v8 = vld [vmem:[%s634_s0 + $0x10] sm:$0xff]  }
   0x4   :  { %478 = vmatprep.subr.bf16.mxu0 %v509_v1  ;;  %501 = vmatprep.subr.bf16.mxu1 %v509_v1  ;;  %v517_v9 = vld [vmem:[%s634_s0 + $0x30] sm:$0xff]   ;;  %v518_v10 = vld [vmem:[%s634_s0 + $0x18] sm:$0xff]   ;;  %v587_v12 = vld [vmem:[%s635_s2] ss:$0 sm:$0xff] }
   0x5   :  { %484 = vmatprep.mubr.msk.bf16.mxu0 %vm110_vm0, %v512_v3  ;;  %492 = vmatprep.mubr.msk.bf16.mxu1 %vm110_vm0, %v513_v4  ;;  %v519_v11 = vld [vmem:[%s634_s0 + $0x38] sm:$0xff]  }
   0x7   :  { %479 = vmatpush3.bf16.msra.mxu0 %v509_v1  ;;  %505 = vmatpush3.bf16.msra.mxu1 %v509_v1 }
   0x8   :  { %480 = vmatprep.subr.bf16.mxu0 %v510_v2  ;;  %502 = vmatprep.subr.bf16.mxu1 %v510_v2 }
   0xb   :  { %481 = vmatpush3.bf16.msra.mxu0 %v510_v2  ;;  %506 = vmatpush3.bf16.msra.mxu1 %v510_v2 }
   0xc   :  { %482 = vmatprep.subr.bf16.mxu0 %v511_v5  ;;  %503 = vmatprep.subr.bf16.mxu1 %v511_v5 }
   0xf   :  { %483 = vmatpush3.bf16.msra.mxu0 %v511_v5  ;;  %507 = vmatpush3.bf16.msra.mxu1 %v511_v5 }
  0x12   :  { %485 = vmatmul.mubr.msk.bf16.vlgmr.msra.gmra.mrb[0].mxu0 %vm110_vm0, %v514_v6  ;;  %493 = vmatmul.mubr.msk.bf16.vlgmr.msra.gmra.mrb[0].mxu1 %vm110_vm0, %v515_v7 }
  0x13   :  { %488 = vmatprep.mubr.msk.bf16.mxu0 %vm110_vm0, %v516_v8  ;;  %496 = vmatprep.mubr.msk.bf16.mxu1 %vm110_vm0, %v517_v9 }
  0x1a   :  { %489 = vmatmul.mubr.msk.bf16.gmra.mrb[4].mxu0 %vm110_vm0, %v518_v10  ;;  %497 = vmatmul.mubr.msk.bf16.gmra.mrb[4].mxu1 %vm110_vm0, %v519_v11 }
  0xe5   :  { %v486_v13 = vpop.f32.mrb[0].mxu0  ;;  %v494_v14 = vpop.f32.mrb[0].mxu1 }
  0xe6   :  { %v178_v15 = vadd.f32 %v486_v13, %v587_v12  ;;  %v210_v16 = vadd.f32 %v494_v14, %v587_v12  ;;  %v169_v17 = vpop.f32.mrb[1].mxu0  ;;  %v201_v18 = vpop.f32.mrb[1].mxu1 }
  0xe7   :  { %v170_v19 = vadd.f32 %v587_v12, %v169_v17  ;;  %v202_v20 = vadd.f32 %v587_v12, %v201_v18  ;;  %v487_v21 = vpop.f32.mrb[2].mxu0  ;;  %v495_v22 = vpop.f32.mrb[2].mxu1 }
  0xe8   :  { %vm234_vm1 = vcmp.gt.f32.partialorder %v178_v15, 0.0  ;;  %v250_v23 = vmul.f32 0.01, %v178_v15  ;;  %vm242_vm2 = vcmp.gt.f32.partialorder %v210_v16, 0.0  ;;  %v258_v24 = vmul.f32 0.01, %v210_v16 }
  0xe9   :  { %vm232_vm3 = vcmp.gt.f32.partialorder %v170_v19, 0.0  ;;  %v248_v25 = vmul.f32 0.01, %v170_v19  ;;  %vm240_vm4 = vcmp.gt.f32.partialorder %v202_v20, 0.0  ;;  %v256_v26 = vmul.f32 0.01, %v202_v20 }
  0xea   :  { %v181_v27 = vadd.f32 %v487_v21, %v587_v12  ;;  %v213_v28 = vadd.f32 %v495_v22, %v587_v12  ;;  %v172_v29 = vpop.f32.mrb[3].mxu0  ;;  %v204_v30 = vpop.f32.mrb[3].mxu1  ;;  %v266_v31 = vsel %vm234_vm1, %v178_v15, %v250_v23  ;;  %v274_v32 = vsel %vm242_vm2, %v210_v16, %v258_v24 }
  0xeb   :  { %v173_v33 = vadd.f32 %v587_v12, %v172_v29  ;;  %v205_v34 = vadd.f32 %v587_v12, %v204_v30  ;;  %v264_v39 = vsel %vm232_vm3, %v170_v19, %v248_v25  ;;  %v272_v40 = vsel %vm240_vm4, %v202_v20, %v256_v26 }
  0xec   :  { %vm235_vm5 = vcmp.gt.f32.partialorder %v181_v27, 0.0  ;;  %v251_v35 = vmul.f32 0.01, %v181_v27  ;;  %vm243_vm6 = vcmp.gt.f32.partialorder %v213_v28, 0.0  ;;  %v259_v36 = vmul.f32 0.01, %v213_v28 }
  0xed   :  { %vm233_vm7 = vcmp.gt.f32.partialorder %v173_v33, 0.0  ;;  %v249_v37 = vmul.f32 0.01, %v173_v33  ;;  %vm241_vm8 = vcmp.gt.f32.partialorder %v205_v34, 0.0  ;;  %v257_v38 = vmul.f32 0.01, %v205_v34 }
  0xee   :  { %v267_v41 = vsel %vm235_vm5, %v181_v27, %v251_v35  ;;  %v275_v42 = vsel %vm243_vm6, %v213_v28, %v259_v36  ;;  %v490_v43 = vpop.f32.mrb[4].mxu0  ;;  %v498_v44 = vpop.f32.mrb[4].mxu1 }
  0xef   :  { %v425_v45 = vpack.c.bf16 %v267_v41, %v266_v31  ;;  %v445_v46 = vpack.c.bf16 %v275_v42, %v274_v32  ;;  %v265_v47 = vsel %vm233_vm7, %v173_v33, %v249_v37  ;;  %v273_v48 = vsel %vm241_vm8, %v205_v34, %v257_v38  ;;  %v185_v49 = vpop.f32.mrb[5].mxu0  ;;  %v217_v50 = vpop.f32.mrb[5].mxu1 }
  0xf0   :  { %v420_v51 = vpack.c.bf16 %v265_v47, %v264_v39  ;;  %v440_v52 = vpack.c.bf16 %v273_v48, %v272_v40  ;;  %v194_v53 = vadd.f32 %v490_v43, %v587_v12  ;;  %v226_v54 = vadd.f32 %v498_v44, %v587_v12  ;;  %v491_v55 = vpop.f32.mrb[6].mxu0  ;;  %v499_v56 = vpop.f32.mrb[6].mxu1 }
  0xf1   :  { %457 = vst [vmem:[%s636_s3 + $0x8] sm:$0xff] %v425_v45   ;;  %461 = vst [vmem:[%s636_s3 + $0x28] sm:$0xff] %v445_v46   ;;  %v186_v57 = vadd.f32 %v587_v12, %v185_v49  ;;  %v218_v58 = vadd.f32 %v587_v12, %v217_v50  ;;  %v197_v59 = vadd.f32 %v491_v55, %v587_v12  ;;  %v188_v61 = vpop.f32.mrb[7].mxu0  ;;  %v220_v62 = vpop.f32.mrb[7].mxu1 }
  0xf2   :  { %v229_v60 = vadd.f32 %v499_v56, %v587_v12  ;;  %421 = vst [vmem:[%s636_s3] sm:$0xff] %v420_v51   ;;  %460 = vst [vmem:[%s636_s3 + $0x20] sm:$0xff] %v440_v52   ;;  %v254_v63 = vmul.f32 0.01, %v194_v53  ;;  %vm238_vm9 = vcmp.gt.f32.partialorder %v194_v53, 0.0  ;;  %v262_v0 = vmul.f32 0.01, %v226_v54 }
  0xf3   :  { %vm246_vm10 = vcmp.gt.f32.partialorder %v226_v54, 0.0  ;;  %vm236_vm11 = vcmp.gt.f32.partialorder %v186_v57, 0.0  ;;  %vm239_vm12 = vcmp.gt.f32.partialorder %v197_v59, 0.0  ;;  %v255_v1 = vmul.f32 0.01, %v197_v59 }
  0xf4   :  { %v252_v2 = vmul.f32 0.01, %v186_v57  ;;  %vm244_vm13 = vcmp.gt.f32.partialorder %v218_v58, 0.0  ;;  %vm247_vm14 = vcmp.gt.f32.partialorder %v229_v60, 0.0  ;;  %v263_v3 = vmul.f32 0.01, %v229_v60 }
  0xf5   :  { %v270_v4 = vsel %vm238_vm9, %v194_v53, %v254_v63  ;;  %v271_v5 = vsel %vm239_vm12, %v197_v59, %v255_v1  ;;  %v189_v6 = vadd.f32 %v587_v12, %v188_v61  ;;  %v221_v7 = vadd.f32 %v587_v12, %v220_v62 }
  0xf6   :  { %v278_v8 = vsel %vm246_vm10, %v226_v54, %v262_v0  ;;  %v260_v9 = vmul.f32 0.01, %v218_v58  ;;  %v435_v10 = vpack.c.bf16 %v271_v5, %v270_v4  ;;  %v279_v11 = vsel %vm247_vm14, %v229_v60, %v263_v3 }
  0xf7   :  { %v455_v13 = vpack.c.bf16 %v279_v11, %v278_v8  ;;  %vm237_vm15 = vcmp.gt.f32.partialorder %v189_v6, 0.0  ;;  %v253_v14 = vmul.f32 0.01, %v189_v6  ;;  %vm245_vm0 = vcmp.gt.f32.partialorder %v221_v7, 0.0 }
  0xf8   :  { %459 = vst [vmem:[%s636_s3 + $0x18] sm:$0xff] %v435_v10   ;;  %v261_v15 = vmul.f32 0.01, %v221_v7  ;;  %v268_v16 = vsel %vm236_vm11, %v186_v57, %v252_v2  ;;  %v276_v17 = vsel %vm244_vm13, %v218_v58, %v260_v9 }
  0xf9   :  { %463 = vst [vmem:[%s636_s3 + $0x38] sm:$0xff] %v455_v13   ;;  %v269_v12 = vsel %vm237_vm15, %v189_v6, %v253_v14 }
  0xfa   :  { %v430_v18 = vpack.c.bf16 %v269_v12, %v268_v16  ;;  %v277_v19 = vsel %vm245_vm0, %v221_v7, %v261_v15 }
  0xfb   :  { %v450_v20 = vpack.c.bf16 %v277_v19, %v276_v17 }
  0xfc   :  { %458 = vst [vmem:[%s636_s3 + $0x10] sm:$0xff] %v430_v18  }
  0xfd   :  { %462 = vst [vmem:[%s636_s3 + $0x30] sm:$0xff] %v450_v20  }

// kernel: vae_forward.11
= control target key start
LH: loop header
LB: loop body
LE: loop exit
PB: predicated region body
PF: predicated region fallthrough
CT: control target
= control target key end

     0   :  { %s1554_s12 = smov 0   ;;  %s1707_s0 = inlined_call_operand.vmem [shape: bf16[512,144], index: 0, kind: input, shape index: {}]   ;;  %s1708_s1 = inlined_call_operand.vmem [shape: bf16[144,128], index: 1, kind: input, shape index: {}]   ;;  %s1709_s2 = inlined_call_operand.vmem [shape: f32[1,128], index: 2, kind: input, shape index: {}]   ;;  %s1710_s3 = inlined_call_operand.vmem [shape: bf16[512,128], index: 3, kind: output, shape index: {}]  }
   0x1 LB: > { %s1051_s13 = sadd.s32 4294967295, %s1531_s12   ;;  %p1055_p0 = scmp.ge.s32.totalorder %s1531_s12, 1  ;;  %s1531_s12 = sphi %s1554_s12, %s13_s12  }
   0x2   : > { %p139_p1 = scmp.lt.s32.totalorder %s1531_s12, 3 }
   0x4   : > { %p140_p2 = pnand %p1055_p0, %p139_p1 }
   0x5   : > { %v1340_v0 = vld [vmem:[%s1708_s1] sm:$0xff] (!%p140_p2)   ;;  %v1533_v1 = vmov (!%p140_p2), 0   ;;  %s1056_s16 = sshll.u32 (!%p140_p2), %s1051_s13, 5  ;;  %v1341_v2 = vld [vmem:[%s1708_s1 + $0x8] sm:$0xff] (!%p140_p2)   ;;  %v1342_v3 = vld [vmem:[%s1708_s1 + $0x10] sm:$0xff] (!%p140_p2)   ;;  %vm433_vm0 = vcmask (!%p140_p2), 130048  }
   0x6   : > { %143 = sbr.rel (%p140_p2) target bundleno = 349 (0x15d), region = 32  ;;  %482 = vmatprep.subr.bf16.mxu0 (!%p140_p2), %v1533_v1  ;;  %1313 = vmatprep.subr.bf16.mxu1 (!%p140_p2), %v1533_v1  ;;  %p165_p3 = scmp.lt.s32.totalorder (!%p140_p2), %s1056_s16, 63  ;;  %v1343_v4 = vld [vmem:[%s1708_s1 + $0x18] sm:$0xff] (!%p140_p2)   ;;  %v1344_v7 = vld [vmem:[%s1708_s1 + $0x20] sm:$0xff] (!%p140_p2)   ;;  %v1345_v8 = vld [vmem:[%s1708_s1 + $0x28] sm:$0xff] (!%p140_p2)  }
   0x7   : > { %483 = vmatpush1.bf16.msra.mxu0 (!%p140_p2), %v1340_v0  ;;  %1322 = vmatpush1.bf16.msra.mxu1 (!%p140_p2), %v1340_v0  ;;  %v1346_v9 = vld [vmem:[%s1708_s1 + $0x30] sm:$0xff] (!%p140_p2)   ;;  %v1347_v10 = vld [vmem:[%s1708_s1 + $0x38] sm:$0xff] (!%p140_p2)   ;;  %v1348_v11 = vld [vmem:[%s1708_s1 + $0x40] sm:$0xff] (!%p140_p2)  }
   0x8   : > { %484 = vmatprep.subr.bf16.mxu0 (!%p140_p2), %v1533_v1  ;;  %1314 = vmatprep.subr.bf16.mxu1 (!%p140_p2), %v1533_v1  ;;  %v1648_v42 = vld [vmem:[%s1709_s2] ss:$0 sm:$0xff] (!%p140_p2) }
   0xb   : > { %485 = vmatpush1.bf16.msra.mxu0 (!%p140_p2), %v1341_v2  ;;  %1323 = vmatpush1.bf16.msra.mxu1 (!%p140_p2), %v1341_v2 }
   0xc   : > { %486 = vmatprep.subr.bf16.mxu0 (!%p140_p2), %v1533_v1  ;;  %1315 = vmatprep.subr.bf16.mxu1 (!%p140_p2), %v1533_v1 }
   0xd   : > { %s1712_s16 = smov (!%p165_p3, %s1056_s16), 63 }
   0xe   : > { %s1185_s21 = sshll.u32 %s1712_s16, 3  ;;  %s1060_s13 = sshll.u32 %s1712_s16, 2 }
   0xf   : > { %s1577_s24 = scalar_lea.vmem %s1707_s0, %s1185_s21  ;;  %487 = vmatpush1.bf16.msra.mxu0 %v1342_v3  ;;  %1324 = vmatpush1.bf16.msra.mxu1 %v1342_v3  ;;  %s1670_s16 = scalar_lea.vmem %s1710_s3, %s1060_s13 }
  0x10   : > { %v1351_v5 = vld [vmem:[%s1577_s24 + $0x4] ss:$8 sps:$4 sm:$0xff]   ;;  %488 = vmatprep.subr.bf16.mxu0 %v1533_v1  ;;  %1316 = vmatprep.subr.bf16.mxu1 %v1533_v1  ;;  %v1349_v12 = vld [vmem:[%s1577_s24] ss:$8 sps:$4 sm:$0xff]   ;;  %v1355_v14 = vld [vmem:[%s1577_s24 + $0x14] ss:$8 sps:$4 sm:$0xff]  }
  0x11   : > { %v1354_v6 = vld [vmem:[%s1577_s24 + $0x84] ss:$8 sps:$4 sm:$0xff]   ;;  %1103 = vmatprep.mubr.msk.bf16.mxu0 %vm433_vm0, %v1351_v5  ;;  %v1352_v13 = vld [vmem:[%s1577_s24 + $0x80] ss:$8 sps:$4 sm:$0xff]   ;;  %v1357_v15 = vld [vmem:[%s1577_s24 + $0x94] ss:$8 sps:$4 sm:$0xff]  }
  0x12   : > { %1111 = vmatprep.mubr.msk.bf16.mxu1 %vm433_vm0, %v1354_v6  ;;  %v1359_v16 = vld [vmem:[%s1577_s24 + $0x10] ss:$8 sps:$4 sm:$0xff]   ;;  %v1361_v18 = vld [vmem:[%s1577_s24 + $0x24] ss:$8 sps:$4 sm:$0xff]   ;;  %v1365_v20 = vld [vmem:[%s1577_s24 + $0x20] ss:$8 sps:$4 sm:$0xff]  }
  0x13   : > { %489 = vmatpush1.bf16.msra.mxu0 %v1343_v4  ;;  %1325 = vmatpush1.bf16.msra.mxu1 %v1343_v4  ;;  %v1360_v17 = vld [vmem:[%s1577_s24 + $0x90] ss:$8 sps:$4 sm:$0xff]   ;;  %v1363_v19 = vld [vmem:[%s1577_s24 + $0xa4] ss:$8 sps:$4 sm:$0xff]   ;;  %v1366_v21 = vld [vmem:[%s1577_s24 + $0xa0] ss:$8 sps:$4 sm:$0xff]  }
  0x14   : > { %490 = vmatprep.subr.bf16.mxu0 %v1533_v1  ;;  %1317 = vmatprep.subr.bf16.mxu1 %v1533_v1  ;;  %v1367_v22 = vld [vmem:[%s1577_s24 + $0x34] ss:$8 sps:$4 sm:$0xff]   ;;  %v1371_v24 = vld [vmem:[%s1577_s24 + $0x30] ss:$8 sps:$4 sm:$0xff]   ;;  %v1373_v26 = vld [vmem:[%s1577_s24 + $0x44] ss:$8 sps:$4 sm:$0xff]  }
  0x15   : > { %v1369_v23 = vld [vmem:[%s1577_s24 + $0xb4] ss:$8 sps:$4 sm:$0xff]   ;;  %v1372_v25 = vld [vmem:[%s1577_s24 + $0xb0] ss:$8 sps:$4 sm:$0xff]   ;;  %v1375_v27 = vld [vmem:[%s1577_s24 + $0xc4] ss:$8 sps:$4 sm:$0xff]  }
  0x16   : > { %v1377_v28 = vld [vmem:[%s1577_s24 + $0x40] ss:$8 sps:$4 sm:$0xff]   ;;  %v1379_v30 = vld [vmem:[%s1577_s24 + $0x54] ss:$8 sps:$4 sm:$0xff]   ;;  %v1383_v32 = vld [vmem:[%s1577_s24 + $0x50] ss:$8 sps:$4 sm:$0xff]  }
  0x17   : > { %491 = vmatpush1.bf16.msra.mxu0 %v1344_v7  ;;  %1326 = vmatpush1.bf16.msra.mxu1 %v1344_v7  ;;  %v1378_v29 = vld [vmem:[%s1577_s24 + $0xc0] ss:$8 sps:$4 sm:$0xff]   ;;  %v1381_v31 = vld [vmem:[%s1577_s24 + $0xd4] ss:$8 sps:$4 sm:$0xff]   ;;  %v1384_v33 = vld [vmem:[%s1577_s24 + $0xd0] ss:$8 sps:$4 sm:$0xff]  }
  0x18   : > { %492 = vmatprep.subr.bf16.mxu0 %v1533_v1  ;;  %1318 = vmatprep.subr.bf16.mxu1 %v1533_v1  ;;  %v1385_v34 = vld [vmem:[%s1577_s24 + $0x64] ss:$8 sps:$4 sm:$0xff]   ;;  %v1389_v36 = vld [vmem:[%s1577_s24 + $0x60] ss:$8 sps:$4 sm:$0xff]   ;;  %v1391_v38 = vld [vmem:[%s1577_s24 + $0x74] ss:$8 sps:$4 sm:$0xff]  }
  0x19   : > { %v1387_v35 = vld [vmem:[%s1577_s24 + $0xe4] ss:$8 sps:$4 sm:$0xff]   ;;  %v1390_v37 = vld [vmem:[%s1577_s24 + $0xe0] ss:$8 sps:$4 sm:$0xff]   ;;  %v1393_v39 = vld [vmem:[%s1577_s24 + $0xf4] ss:$8 sps:$4 sm:$0xff]  }
  0x1a   : > { %v1395_v40 = vld [vmem:[%s1577_s24 + $0x70] ss:$8 sps:$4 sm:$0xff]  }
  0x1b   : > { %493 = vmatpush1.bf16.msra.mxu0 %v1345_v8  ;;  %1327 = vmatpush1.bf16.msra.mxu1 %v1345_v8  ;;  %v1396_v41 = vld [vmem:[%s1577_s24 + $0xf0] ss:$8 sps:$4 sm:$0xff]  }
  0x1c   : > { %494 = vmatprep.subr.bf16.mxu0 %v1533_v1  ;;  %1319 = vmatprep.subr.bf16.mxu1 %v1533_v1 }
  0x1f   : > { %495 = vmatpush1.bf16.msra.mxu0 %v1346_v9  ;;  %1328 = vmatpush1.bf16.msra.mxu1 %v1346_v9 }
  0x20   : > { %496 = vmatprep.subr.bf16.mxu0 %v1533_v1  ;;  %1320 = vmatprep.subr.bf16.mxu1 %v1533_v1 }
  0x23   : > { %497 = vmatpush1.bf16.msra.mxu0 %v1347_v10  ;;  %1329 = vmatpush1.bf16.msra.mxu1 %v1347_v10 }
  0x24   : > { %498 = vmatprep.subr.bf16.mxu0 %v1533_v1  ;;  %1321 = vmatprep.subr.bf16.mxu1 %v1533_v1 }
  0x27   : > { %499 = vmatpush1.bf16.msra.mxu0 %v1348_v11  ;;  %1330 = vmatpush1.bf16.msra.mxu1 %v1348_v11 }
  0x2a   : > { %515 = vmatmul.mubr.bf16.vlgmr.msra.gmra.mrb[0].mxu0 %v1349_v12  ;;  %579 = vmatmul.mubr.bf16.vlgmr.msra.gmra.mrb[0].mxu1 %v1352_v13 }
  0x2b   : > { %1104 = vmatprep.mubr.msk.bf16.mxu0 %vm433_vm0, %v1355_v14  ;;  %1112 = vmatprep.mubr.msk.bf16.mxu1 %vm433_vm0, %v1357_v15 }
  0x32   : > { %523 = vmatmul.mubr.bf16.gmra.mrb[4].mxu0 %v1359_v16  ;;  %587 = vmatmul.mubr.bf16.gmra.mrb[4].mxu1 %v1360_v17 }
  0x33   : > { %1105 = vmatprep.mubr.msk.bf16.mxu0 %vm433_vm0, %v1361_v18  ;;  %1113 = vmatprep.mubr.msk.bf16.mxu1 %vm433_vm0, %v1363_v19 }
  0x3a   : > { %531 = vmatmul.mubr.bf16.gmra.mrb[8].mxu0 %v1365_v20  ;;  %595 = vmatmul.mubr.bf16.gmra.mrb[8].mxu1 %v1366_v21 }
  0x3b   : > { %1106 = vmatprep.mubr.msk.bf16.mxu0 %vm433_vm0, %v1367_v22  ;;  %1114 = vmatprep.mubr.msk.bf16.mxu1 %vm433_vm0, %v1369_v23 }
  0x42   : > { %539 = vmatmul.mubr.bf16.gmra.mrb[12].mxu0 %v1371_v24  ;;  %603 = vmatmul.mubr.bf16.gmra.mrb[12].mxu1 %v1372_v25 }
  0x43   : > { %1107 = vmatprep.mubr.msk.bf16.mxu0 %vm433_vm0, %v1373_v26  ;;  %1115 = vmatprep.mubr.msk.bf16.mxu1 %vm433_vm0, %v1375_v27 }
  0x4a   : > { %547 = vmatmul.mubr.bf16.gmra.mrb[16].mxu0 %v1377_v28  ;;  %611 = vmatmul.mubr.bf16.gmra.mrb[16].mxu1 %v1378_v29 }
  0x4b   : > { %1108 = vmatprep.mubr.msk.bf16.mxu0 %vm433_vm0, %v1379_v30  ;;  %1116 = vmatprep.mubr.msk.bf16.mxu1 %vm433_vm0, %v1381_v31 }
  0x52   : > { %555 = vmatmul.mubr.bf16.gmra.mrb[20].mxu0 %v1383_v32  ;;  %619 = vmatmul.mubr.bf16.gmra.mrb[20].mxu1 %v1384_v33 }
  0x53   : > { %1109 = vmatprep.mubr.msk.bf16.mxu0 %vm433_vm0, %v1385_v34  ;;  %1117 = vmatprep.mubr.msk.bf16.mxu1 %vm433_vm0, %v1387_v35 }
  0x5a   : > { %563 = vmatmul.mubr.bf16.gmra.mrb[24].mxu0 %v1389_v36  ;;  %627 = vmatmul.mubr.bf16.gmra.mrb[24].mxu1 %v1390_v37 }
  0x5b   : > { %1110 = vmatprep.mubr.msk.bf16.mxu0 %vm433_vm0, %v1391_v38  ;;  %1118 = vmatprep.mubr.msk.bf16.mxu1 %vm433_vm0, %v1393_v39 }
  0x62   : > { %571 = vmatmul.mubr.bf16.gmra.mrb[28].mxu0 %v1395_v40  ;;  %635 = vmatmul.mubr.bf16.gmra.mrb[28].mxu1 %v1396_v41 }
  0xfd   : > { %v516_v43 = vpop.f32.mrb[0].mxu0  ;;  %v580_v44 = vpop.f32.mrb[0].mxu1 }
  0xfe   : > { %v517_v45 = vadd.f32 %v1648_v42, %v516_v43  ;;  %v581_v46 = vadd.f32 %v1648_v42, %v580_v44  ;;  %v518_v47 = vpop.f32.mrb[1].mxu0  ;;  %v582_v48 = vpop.f32.mrb[1].mxu1 }
  0xff   : > { %v519_v49 = vpop.f32.mrb[2].mxu0  ;;  %v583_v50 = vpop.f32.mrb[2].mxu1 }
 0x100   : > { %v1119_v51 = vmul.f32 -1.442695, %v517_v45  ;;  %v1135_v52 = vmul.f32 -1.442695, %v581_v46  ;;  %v520_v53 = vadd.f32 %v1648_v42, %v519_v49  ;;  %v584_v54 = vadd.f32 %v1648_v42, %v583_v50  ;;  %v521_v55 = vpop.f32.mrb[3].mxu0  ;;  %v585_v56 = vpop.f32.mrb[3].mxu1 }
 0x102   : > { %1397 = vpow2.f32 %v1119_v51  ;;  %v1120_v57 = vmul.f32 -1.442695, %v520_v53  ;;  %v1136_v58 = vmul.f32 -1.442695, %v584_v54 }
 0x103   : > { %1399 = vpow2.f32 %v1135_v52 }
 0x104   : > { %1401 = vpow2.f32 %v1120_v57 }
 0x105   : > { %1403 = vpow2.f32 %v1136_v58  ;;  %v524_v59 = vpop.f32.mrb[4].mxu0  ;;  %v588_v60 = vpop.f32.mrb[4].mxu1 }
 0x106   : > { %v525_v61 = vadd.f32 %v1648_v42, %v524_v59  ;;  %v589_v62 = vadd.f32 %v1648_v42, %v588_v60  ;;  %v526_v63 = vpop.f32.mrb[5].mxu0  ;;  %v590_v0 = vpop.f32.mrb[5].mxu1 }
 0x107   : > { %v527_v1 = vpop.f32.mrb[6].mxu0  ;;  %v591_v2 = vpop.f32.mrb[6].mxu1 }
 0x108   : > { %v1121_v3 = vmul.f32 -1.442695, %v525_v61  ;;  %v1137_v4 = vmul.f32 -1.442695, %v589_v62  ;;  %v528_v5 = vadd.f32 %v1648_v42, %v527_v1  ;;  %v592_v6 = vadd.f32 %v1648_v42, %v591_v2  ;;  %v529_v7 = vpop.f32.mrb[7].mxu0  ;;  %v593_v8 = vpop.f32.mrb[7].mxu1 }
 0x10a   : > { %1405 = vpow2.f32 %v1121_v3  ;;  %v1122_v9 = vmul.f32 -1.442695, %v528_v5  ;;  %v1138_v10 = vmul.f32 -1.442695, %v592_v6 }
 0x10b   : > { %1407 = vpow2.f32 %v1137_v4 }
 0x10c   : > { %v1398_v11 = vpop.eup %1397  ;;  %1409 = vpow2.f32 %v1122_v9 }
 0x10d   : > { %v1400_v12 = vpop.eup %1399  ;;  %v739_v13 = vadd.f32 1.0, %v1398_v11  ;;  %1411 = vpow2.f32 %v1138_v10  ;;  %v532_v14 = vpop.f32.mrb[8].mxu0 }
 0x10e   : > { %v596_v15 = vpop.f32.mrb[8].mxu1  ;;  %v1402_v16 = vpop.eup %1401  ;;  %v755_v17 = vadd.f32 1.0, %v1400_v12  ;;  %v533_v18 = vadd.f32 %v1648_v42, %v532_v14 }
 0x10f   : > { %v597_v19 = vadd.f32 %v1648_v42, %v596_v15  ;;  %v534_v20 = vpop.f32.mrb[9].mxu0  ;;  %v598_v21 = vpop.f32.mrb[9].mxu1  ;;  %1413 = vrcp.f32 %v739_v13  ;;  %v740_v23 = vadd.f32 1.0, %v1402_v16 }
 0x110   : > { %v1404_v22 = vpop.eup %1403  ;;  %v535_v24 = vpop.f32.mrb[10].mxu0  ;;  %1415 = vrcp.f32 %v755_v17  ;;  %v1123_v27 = vmul.f32 -1.442695, %v533_v18 }
 0x111   : > { %v599_v25 = vpop.f32.mrb[10].mxu1  ;;  %v756_v26 = vadd.f32 1.0, %v1404_v22  ;;  %v1139_v28 = vmul.f32 -1.442695, %v597_v19  ;;  %v537_v29 = vpop.f32.mrb[11].mxu0  ;;  %1417 = vrcp.f32 %v740_v23  ;;  %v536_v30 = vadd.f32 %v1648_v42, %v535_v24 }
 0x112   : > { %v600_v31 = vadd.f32 %v1648_v42, %v599_v25  ;;  %v601_v32 = vpop.f32.mrb[11].mxu1 }
 0x113   : > { %1419 = vrcp.f32 %v756_v26  ;;  %v1124_v33 = vmul.f32 -1.442695, %v536_v30 }
 0x114   : > { %1421 = vpow2.f32 %v1123_v27  ;;  %v1140_v34 = vmul.f32 -1.442695, %v600_v31  ;;  %v1406_v35 = vpop.eup %1405 }
 0x115   : > { %1423 = vpow2.f32 %v1139_v28  ;;  %v1408_v36 = vpop.eup %1407  ;;  %v741_v37 = vadd.f32 1.0, %v1406_v35  ;;  %v540_v38 = vpop.f32.mrb[12].mxu0 }
 0x116   : > { %1425 = vpow2.f32 %v1124_v33  ;;  %v604_v39 = vpop.f32.mrb[12].mxu1  ;;  %v1410_v40 = vpop.eup %1409  ;;  %v757_v41 = vadd.f32 1.0, %v1408_v36  ;;  %v541_v43 = vadd.f32 %v1648_v42, %v540_v38 }
 0x117   : > { %1427 = vpow2.f32 %v1140_v34  ;;  %v605_v44 = vadd.f32 %v1648_v42, %v604_v39  ;;  %v542_v45 = vpop.f32.mrb[13].mxu0  ;;  %v606_v46 = vpop.f32.mrb[13].mxu1  ;;  %v742_v48 = vadd.f32 1.0, %v1410_v40 }
 0x118   : > { %v1412_v47 = vpop.eup %1411  ;;  %1429 = vrcp.f32 %v741_v37  ;;  %v543_v49 = vpop.f32.mrb[14].mxu0  ;;  %v1125_v52 = vmul.f32 -1.442695, %v541_v43 }
 0x119   : > { %v607_v50 = vpop.f32.mrb[14].mxu1  ;;  %1431 = vrcp.f32 %v757_v41  ;;  %v758_v51 = vadd.f32 1.0, %v1412_v47  ;;  %v1141_v53 = vmul.f32 -1.442695, %v605_v44  ;;  %v545_v54 = vpop.f32.mrb[15].mxu0  ;;  %v544_v56 = vadd.f32 %v1648_v42, %v543_v49 }
 0x11a   : > { %v1414_v55 = vpop.eup %1413  ;;  %1433 = vrcp.f32 %v742_v48  ;;  %v608_v57 = vadd.f32 %v1648_v42, %v607_v50  ;;  %v609_v58 = vpop.f32.mrb[15].mxu1 }
 0x11b   : > { %v1416_v59 = vpop.eup %1415  ;;  %1435 = vrcp.f32 %v758_v51  ;;  %v1126_v61 = vmul.f32 -1.442695, %v544_v56 }
 0x11c   : > { %v1418_v60 = vpop.eup %1417  ;;  %1437 = vpow2.f32 %v1125_v52  ;;  %v1142_v62 = vmul.f32 -1.442695, %v608_v57 }
 0x11d   : > { %v1420_v63 = vpop.eup %1419  ;;  %v1221_v0 = vpack.c.bf16 %v1418_v60, %v1414_v55  ;;  %1439 = vpow2.f32 %v1141_v53  ;;  %v548_v3 = vpop.f32.mrb[16].mxu0 }
 0x11e   : > { %v1422_v1 = vpop.eup %1421  ;;  %v1261_v2 = vpack.c.bf16 %v1420_v63, %v1416_v59  ;;  %1441 = vpow2.f32 %v1126_v61  ;;  %v612_v4 = vpop.f32.mrb[16].mxu1  ;;  %v549_v7 = vadd.f32 %v1648_v42, %v548_v3 }
 0x11f   : > { %v1424_v5 = vpop.eup %1423  ;;  %1222 = vst [vmem:[%s1670_s16] sm:$0xff] %v1221_v0   ;;  %v743_v6 = vadd.f32 1.0, %v1422_v1  ;;  %1443 = vpow2.f32 %v1142_v62  ;;  %v613_v8 = vadd.f32 %v1648_v42, %v612_v4  ;;  %v550_v9 = vpop.f32.mrb[17].mxu0 }
 0x120   : > { %v614_v10 = vpop.f32.mrb[17].mxu1  ;;  %v1426_v11 = vpop.eup %1425  ;;  %1305 = vst [vmem:[%s1670_s16 + $0x40] sm:$0xff] %v1261_v2   ;;  %v759_v12 = vadd.f32 1.0, %v1424_v5  ;;  %v1127_v17 = vmul.f32 -1.442695, %v549_v7 }
 0x121   : > { %v551_v13 = vpop.f32.mrb[18].mxu0  ;;  %v615_v14 = vpop.f32.mrb[18].mxu1  ;;  %1445 = vrcp.f32 %v743_v6  ;;  %v744_v16 = vadd.f32 1.0, %v1426_v11  ;;  %v1143_v18 = vmul.f32 -1.442695, %v613_v8 }
 0x122   : > { %v1428_v15 = vpop.eup %1427  ;;  %v553_v19 = vpop.f32.mrb[19].mxu0  ;;  %1447 = vrcp.f32 %v759_v12  ;;  %v552_v22 = vadd.f32 %v1648_v42, %v551_v13  ;;  %v616_v23 = vadd.f32 %v1648_v42, %v615_v14 }
 0x123   : > { %v1430_v20 = vpop.eup %1429  ;;  %v760_v21 = vadd.f32 1.0, %v1428_v15  ;;  %v617_v24 = vpop.f32.mrb[19].mxu1  ;;  %1449 = vrcp.f32 %v744_v16 }
 0x124   : > { %v1432_v25 = vpop.eup %1431  ;;  %v1128_v27 = vmul.f32 -1.442695, %v552_v22  ;;  %v1144_v28 = vmul.f32 -1.442695, %v616_v23 }
 0x125   : > { %v1434_v26 = vpop.eup %1433  ;;  %1451 = vrcp.f32 %v760_v21  ;;  %v556_v33 = vpop.f32.mrb[20].mxu0 }
 0x126   : > { %v1436_v29 = vpop.eup %1435  ;;  %v1226_v30 = vpack.c.bf16 %v1434_v26, %v1430_v20  ;;  %1453 = vpow2.f32 %v1127_v17  ;;  %v620_v34 = vpop.f32.mrb[20].mxu1  ;;  %v557_v37 = vadd.f32 %v1648_v42, %v556_v33 }
 0x127   : > { %v1438_v31 = vpop.eup %1437  ;;  %v1266_v32 = vpack.c.bf16 %v1436_v29, %v1432_v25  ;;  %1455 = vpow2.f32 %v1143_v18  ;;  %v621_v38 = vadd.f32 %v1648_v42, %v620_v34  ;;  %v558_v39 = vpop.f32.mrb[21].mxu0 }
 0x128   : > { %v1440_v35 = vpop.eup %1439  ;;  %1298 = vst [vmem:[%s1670_s16 + $0x8] sm:$0xff] %v1226_v30   ;;  %v745_v36 = vadd.f32 1.0, %v1438_v31  ;;  %1457 = vpow2.f32 %v1128_v27  ;;  %v622_v40 = vpop.f32.mrb[21].mxu1  ;;  %v1129_v48 = vmul.f32 -1.442695, %v557_v37 }
 0x129   : > { %v1442_v41 = vpop.eup %1441  ;;  %1306 = vst [vmem:[%s1670_s16 + $0x48] sm:$0xff] %v1266_v32   ;;  %v761_v43 = vadd.f32 1.0, %v1440_v35  ;;  %1459 = vpow2.f32 %v1144_v28  ;;  %v559_v44 = vpop.f32.mrb[22].mxu0  ;;  %v1145_v49 = vmul.f32 -1.442695, %v621_v38 }
 0x12a   : > { %v623_v45 = vpop.f32.mrb[22].mxu1  ;;  %v1444_v46 = vpop.eup %1443  ;;  %1461 = vrcp.f32 %v745_v36  ;;  %v746_v47 = vadd.f32 1.0, %v1442_v41  ;;  %v560_v52 = vadd.f32 %v1648_v42, %v559_v44 }
 0x12b   : > { %v561_v50 = vpop.f32.mrb[23].mxu0  ;;  %1463 = vrcp.f32 %v761_v43  ;;  %v762_v51 = vadd.f32 1.0, %v1444_v46  ;;  %v624_v53 = vadd.f32 %v1648_v42, %v623_v45  ;;  %v625_v54 = vpop.f32.mrb[23].mxu1 }
 0x12c   : > { %v1446_v55 = vpop.eup %1445  ;;  %1465 = vrcp.f32 %v746_v47  ;;  %v1130_v57 = vmul.f32 -1.442695, %v560_v52 }
 0x12d   : > { %v1448_v56 = vpop.eup %1447  ;;  %1467 = vrcp.f32 %v762_v51  ;;  %v1146_v58 = vmul.f32 -1.442695, %v624_v53  ;;  %v564_v62 = vpop.f32.mrb[24].mxu0 }
 0x12e   : > { %v1450_v59 = vpop.eup %1449  ;;  %1469 = vpow2.f32 %v1129_v48  ;;  %v628_v63 = vpop.f32.mrb[24].mxu1  ;;  %v565_v2 = vadd.f32 %v1648_v42, %v564_v62 }
 0x12f   : > { %v1452_v60 = vpop.eup %1451  ;;  %v1231_v61 = vpack.c.bf16 %v1450_v59, %v1446_v55  ;;  %1471 = vpow2.f32 %v1145_v49  ;;  %v629_v3 = vadd.f32 %v1648_v42, %v628_v63  ;;  %v566_v4 = vpop.f32.mrb[25].mxu0 }
 0x130   : > { %v1454_v0 = vpop.eup %1453  ;;  %v1271_v1 = vpack.c.bf16 %v1452_v60, %v1448_v56  ;;  %1473 = vpow2.f32 %v1130_v57  ;;  %v630_v5 = vpop.f32.mrb[25].mxu1  ;;  %v1131_v16 = vmul.f32 -1.442695, %v565_v2 }
 0x131   : > { %v1456_v6 = vpop.eup %1455  ;;  %1299 = vst [vmem:[%s1670_s16 + $0x10] sm:$0xff] %v1231_v61   ;;  %v747_v7 = vadd.f32 1.0, %v1454_v0  ;;  %1475 = vpow2.f32 %v1146_v58  ;;  %v567_v8 = vpop.f32.mrb[26].mxu0  ;;  %v1147_v21 = vmul.f32 -1.442695, %v629_v3 }
 0x132   : > { %v631_v9 = vpop.f32.mrb[26].mxu1  ;;  %v1458_v10 = vpop.eup %1457  ;;  %1307 = vst [vmem:[%s1670_s16 + $0x50] sm:$0xff] %v1271_v1   ;;  %v763_v11 = vadd.f32 1.0, %v1456_v6  ;;  %v568_v12 = vadd.f32 %v1648_v42, %v567_v8 }
 0x133   : > { %v569_v13 = vpop.f32.mrb[27].mxu0  ;;  %v1460_v14 = vpop.eup %1459  ;;  %1477 = vrcp.f32 %v747_v7  ;;  %v748_v15 = vadd.f32 1.0, %v1458_v10  ;;  %v632_v17 = vadd.f32 %v1648_v42, %v631_v9 }
 0x134   : > { %v633_v18 = vpop.f32.mrb[27].mxu1  ;;  %v1462_v19 = vpop.eup %1461  ;;  %1479 = vrcp.f32 %v763_v11  ;;  %v764_v20 = vadd.f32 1.0, %v1460_v14  ;;  %v1132_v23 = vmul.f32 -1.442695, %v568_v12 }
 0x135   : > { %v1464_v22 = vpop.eup %1463  ;;  %1481 = vrcp.f32 %v748_v15  ;;  %v1148_v25 = vmul.f32 -1.442695, %v632_v17  ;;  %v572_v28 = vpop.f32.mrb[28].mxu0 }
 0x136   : > { %v1466_v24 = vpop.eup %1465  ;;  %1483 = vrcp.f32 %v764_v20  ;;  %v636_v29 = vpop.f32.mrb[28].mxu1  ;;  %v573_v32 = vadd.f32 %v1648_v42, %v572_v28 }
 0x137   : > { %v1468_v26 = vpop.eup %1467  ;;  %v1236_v27 = vpack.c.bf16 %v1466_v24, %v1462_v19  ;;  %1485 = vpow2.f32 %v1131_v16  ;;  %v637_v33 = vadd.f32 %v1648_v42, %v636_v29  ;;  %v574_v34 = vpop.f32.mrb[29].mxu0 }
 0x138   : > { %v1470_v30 = vpop.eup %1469  ;;  %v1276_v31 = vpack.c.bf16 %v1468_v26, %v1464_v22  ;;  %1487 = vpow2.f32 %v1147_v21  ;;  %v638_v35 = vpop.f32.mrb[29].mxu1  ;;  %v1133_v43 = vmul.f32 -1.442695, %v573_v32 }
 0x139   : > { %v1472_v36 = vpop.eup %1471  ;;  %1300 = vst [vmem:[%s1670_s16 + $0x18] sm:$0xff] %v1236_v27   ;;  %v749_v37 = vadd.f32 1.0, %v1470_v30  ;;  %1489 = vpow2.f32 %v1132_v23  ;;  %v575_v38 = vpop.f32.mrb[30].mxu0  ;;  %v1149_v51 = vmul.f32 -1.442695, %v637_v33 }
 0x13a   : > { %v639_v39 = vpop.f32.mrb[30].mxu1  ;;  %v1474_v40 = vpop.eup %1473  ;;  %1308 = vst [vmem:[%s1670_s16 + $0x58] sm:$0xff] %v1276_v31   ;;  %v765_v41 = vadd.f32 1.0, %v1472_v36  ;;  %1491 = vpow2.f32 %v1148_v25  ;;  %v576_v47 = vadd.f32 %v1648_v42, %v575_v38 }
 0x13b   : > { %v577_v44 = vpop.f32.mrb[31].mxu0  ;;  %v1476_v45 = vpop.eup %1475  ;;  %1493 = vrcp.f32 %v749_v37  ;;  %v750_v46 = vadd.f32 1.0, %v1474_v40  ;;  %v640_v48 = vadd.f32 %v1648_v42, %v639_v39 }
 0x13c   : > { %v641_v49 = vpop.f32.mrb[31].mxu1  ;;  %1495 = vrcp.f32 %v765_v41  ;;  %v766_v50 = vadd.f32 1.0, %v1476_v45  ;;  %v1134_v53 = vmul.f32 -1.442695, %v576_v47 }
 0x13d   : > { %v1478_v52 = vpop.eup %1477  ;;  %1497 = vrcp.f32 %v750_v46  ;;  %v1150_v55 = vmul.f32 -1.442695, %v640_v48 }
 0x13e   : > { %v1480_v54 = vpop.eup %1479  ;;  %1499 = vrcp.f32 %v766_v50 }
 0x13f   : > { %v1482_v56 = vpop.eup %1481  ;;  %1501 = vpow2.f32 %v1133_v43 }
 0x140   : > { %v1484_v57 = vpop.eup %1483  ;;  %v1241_v58 = vpack.c.bf16 %v1482_v56, %v1478_v52  ;;  %1503 = vpow2.f32 %v1149_v51 }
 0x141   : > { %v1486_v59 = vpop.eup %1485  ;;  %v1281_v60 = vpack.c.bf16 %v1484_v57, %v1480_v54  ;;  %1505 = vpow2.f32 %v1134_v53 }
 0x142   : > { %v1488_v42 = vpop.eup %1487  ;;  %1301 = vst [vmem:[%s1670_s16 + $0x20] sm:$0xff] %v1241_v58   ;;  %v751_v61 = vadd.f32 1.0, %v1486_v59  ;;  %1507 = vpow2.f32 %v1150_v55 }
 0x143   : > { %v1490_v62 = vpop.eup %1489  ;;  %1309 = vst [vmem:[%s1670_s16 + $0x60] sm:$0xff] %v1281_v60   ;;  %v767_v63 = vadd.f32 1.0, %v1488_v42 }
 0x144   : > { %v1492_v0 = vpop.eup %1491  ;;  %1509 = vrcp.f32 %v751_v61  ;;  %v752_v1 = vadd.f32 1.0, %v1490_v62 }
 0x145   : > { %v1494_v2 = vpop.eup %1493  ;;  %1511 = vrcp.f32 %v767_v63  ;;  %v768_v3 = vadd.f32 1.0, %v1492_v0 }
 0x146   : > { %v1496_v4 = vpop.eup %1495  ;;  %1513 = vrcp.f32 %v752_v1 }
 0x147   : > { %v1498_v5 = vpop.eup %1497  ;;  %1515 = vrcp.f32 %v768_v3 }
 0x148   : > { %v1500_v6 = vpop.eup %1499  ;;  %v1246_v7 = vpack.c.bf16 %v1498_v5, %v1494_v2 }
 0x149   : > { %v1502_v8 = vpop.eup %1501  ;;  %v1286_v9 = vpack.c.bf16 %v1500_v6, %v1496_v4 }
 0x14a   : > { %v1504_v10 = vpop.eup %1503  ;;  %1302 = vst [vmem:[%s1670_s16 + $0x28] sm:$0xff] %v1246_v7   ;;  %v753_v11 = vadd.f32 1.0, %v1502_v8 }
 0x14b   : > { %v1506_v12 = vpop.eup %1505  ;;  %1310 = vst [vmem:[%s1670_s16 + $0x68] sm:$0xff] %v1286_v9   ;;  %v769_v13 = vadd.f32 1.0, %v1504_v10 }
 0x14c   : > { %v1508_v14 = vpop.eup %1507  ;;  %1517 = vrcp.f32 %v753_v11  ;;  %v754_v15 = vadd.f32 1.0, %v1506_v12 }
 0x14d   : > { %1519 = vrcp.f32 %v769_v13  ;;  %v770_v16 = vadd.f32 1.0, %v1508_v14 }
 0x14e   : > { %v1510_v17 = vpop.eup %1509  ;;  %1521 = vrcp.f32 %v754_v15 }
 0x14f   : > { %v1512_v18 = vpop.eup %1511  ;;  %1523 = vrcp.f32 %v770_v16 }
 0x150   : > { %v1514_v19 = vpop.eup %1513 }
 0x151   : > { %v1516_v20 = vpop.eup %1515  ;;  %v1251_v21 = vpack.c.bf16 %v1514_v19, %v1510_v17 }
 0x152   : > { %v1291_v22 = vpack.c.bf16 %v1516_v20, %v1512_v18 }
 0x153   : > { %1303 = vst [vmem:[%s1670_s16 + $0x30] sm:$0xff] %v1251_v21  }
 0x154   : > { %1311 = vst [vmem:[%s1670_s16 + $0x70] sm:$0xff] %v1291_v22  }
 0x156   : > { %v1518_v23 = vpop.eup %1517 }
 0x157   : > { %v1520_v24 = vpop.eup %1519 }
 0x158   : > { %v1522_v25 = vpop.eup %1521 }
 0x159   : > { %v1524_v26 = vpop.eup %1523  ;;  %v1256_v27 = vpack.c.bf16 %v1522_v25, %v1518_v23 }
 0x15a   : > { %v1296_v28 = vpack.c.bf16 %v1524_v26, %v1520_v24 }
 0x15b   : > { %1304 = vst [vmem:[%s1670_s16 + $0x38] sm:$0xff] %v1256_v27  }
 0x15c   : > { %1312 = vst [vmem:[%s1670_s16 + $0x78] sm:$0xff] %v1296_v28  }
 0x15d PF: > { %s13_s12 = sadd.s32 1, %s1531_s12  }
 0x15e   : > { %p10_p4 = scmp.ge.s32.totalorder %s13_s12, 4  }
 0x160   :  { %12 = sbr.rel (!%p10_p4) target bundleno = 1 (0x1), region = 62 }

</bundles_post_ra>
